<compile_context>
chip_gen: v7x
topology: tpu7x:2x2x1
jax: 0.10.0
libtpu: 0.0.40
codegen_flags: <defaults>
</compile_context>

<pallas_src>
import jax
import jax.numpy as jnp
from jax import lax
from jax.experimental import pallas as pl
from jax.experimental.pallas import tpu as pltpu


def bilstm_kernel(x2d_ref, wih_ref, whh_ref, bias_ref, out_ref, xg_ref):
    """Bidirectional LSTM over the whole sequence in one kernel invocation.

    x2d_ref : (T*B, NIN)   flattened input sequence
    wih_ref : (NIN, 8H)    per-gate interleaved [i_f i_b f_f f_b g_f g_b o_f o_b]
    whh_ref : (2H, 8H)     rows [h_f | h_b]; fwd rows feed only *_f columns,
                           bwd rows only *_b columns (block-structured)
    bias_ref: (1, 8H)      b_ih + b_hh pre-summed, same interleaved order
    out_ref : (T, B, 2H)   [..., :H] = forward h, [..., H:] = backward h
    xg_ref  : (T*B, 8H)    VMEM scratch for the hoisted input projection
    """
    T, B, H2 = out_ref.shape
    H = H2 // 2
    TG = 8 * H

    # Phase 1: input projection for every timestep and both directions in a
    # single MXU matmul; bias broadcast-added exactly once. Result staged in
    # VMEM scratch so the unrolled recurrence loads (B, 8H) rows on demand.
    xg_ref[...] = (jnp.dot(x2d_ref[...], wih_ref[...],
                           preferred_element_type=jnp.float32)
                   + bias_ref[...])

    # Precomputed (hoisted) lane mask selecting forward-direction columns of
    # the interleaved layout: within each 2H gate block, first H lanes = fwd.
    col = lax.broadcasted_iota(jnp.int32, (B, TG), 1)
    fwd_mask = (col % (2 * H)) < H

    def sigmoid(v):
        # Exact identity sigma(x) = 0.5*tanh(0.5x)+0.5 -> single EUP op.
        return 0.5 * jnp.tanh(0.5 * v) + 0.5

    # Packed state: h = [h_fwd | h_bwd], c = [c_fwd | c_bwd], each (B, 2H).
    h = jnp.zeros((B, H2), jnp.float32)
    c = jnp.zeros((B, H2), jnp.float32)

    # Phase 2: recurrence, fully unrolled (T small & static). Forward
    # consumes timestep t, backward consumes T-1-t; the block-structured
    # W_hh lets both directions share a single recurrent matmul per step,
    # and the interleaved gate layout lets the cell run once on 2H tiles.
    for t in range(T):
        tb = T - 1 - t
        rec = jnp.dot(h, whh_ref[...],
                      preferred_element_type=jnp.float32)        # (B, 8H)
        gx = jnp.where(fwd_mask,
                       xg_ref[t * B:(t + 1) * B, :],
                       xg_ref[tb * B:(tb + 1) * B, :])            # (B, 8H)
        gates = gx + rec

        # i|f block is contiguous (lane-aligned 4H wide): one sigmoid call.
        ifg = sigmoid(gates[:, :4 * H])
        i = ifg[:, :2 * H]
        f = ifg[:, 2 * H:]
        g = jnp.tanh(gates[:, 4 * H:6 * H])
        o = sigmoid(gates[:, 6 * H:])

        c = f * c + i * g
        h = o * jnp.tanh(c)

        out_ref[t, :, :H] = h[:, :H]     # forward direction at timestep t
        out_ref[tb, :, H:] = h[:, H:]    # backward direction at timestep tb


def pack_params(params):
    """One-time packing of per-direction LSTM weights into the interleaved
    per-gate layout consumed by the kernel. Call OUTSIDE the jitted path."""
    H = params["whh_f"].shape[0]

    def interleave(a_f, a_b):
        # (rows, 4H) x2 -> (rows, 8H) ordered [i_f i_b f_f f_b g_f g_b o_f o_b]
        rows = a_f.shape[0]
        a_f = a_f.reshape(rows, 4, H)
        a_b = a_b.reshape(rows, 4, H)
        return jnp.concatenate([a_f, a_b], axis=-1).reshape(rows, 8 * H)

    z = jnp.zeros((H, 4 * H), jnp.float32)
    return {
        "wih": interleave(params["wih_f"], params["wih_b"]),        # (NIN, 8H)
        "bias": interleave(params["b_f"], params["b_b"]),           # (1, 8H)
        "whh": jnp.concatenate(
            [interleave(params["whh_f"], z),                        # h_f rows
             interleave(z, params["whh_b"])], axis=0),              # h_b rows
    }


def simple_lstm_forward(x, packed):
    """x: (T, B, num_in) float32.  Returns (T, B, 2*num_hidden)."""
    T, B, NIN = x.shape
    H = packed["wih"].shape[1] // 8

    x2d = x.reshape(T * B, NIN)
    vmem = pl.BlockSpec(memory_space=pltpu.MemorySpace.VMEM)

    return pl.pallas_call(
        bilstm_kernel,
        out_shape=jax.ShapeDtypeStruct((T, B, 2 * H), jnp.float32),
        in_specs=[vmem, vmem, vmem, vmem],
        out_specs=vmem,
        scratch_shapes=[pltpu.VMEM((T * B, 8 * H), jnp.float32)],
    )(x2d, packed["wih"], packed["whh"], packed["bias"])


# ----- pure-JAX reference (lax.scan) to validate kernel semantics -----------
def _ref_lstm_dir(x, wih, whh, bias, H):
    def step(carry, xt):
        h, c = carry
        gates = xt @ wih + h @ whh + bias[0]
        i = jax.nn.sigmoid(gates[:, 0 * H:1 * H])
        f = jax.nn.sigmoid(gates[:, 1 * H:2 * H])
        g = jnp.tanh(gates[:, 2 * H:3 * H])
        o = jax.nn.sigmoid(gates[:, 3 * H:4 * H])
        c = f * c + i * g
        h = o * jnp.tanh(c)
        return (h, c), h
    B = x.shape[1]
    init = (jnp.zeros((B, H), jnp.float32), jnp.zeros((B, H), jnp.float32))
    _, hs = lax.scan(step, init, x)
    return hs


def simple_lstm_reference(x, params):
    H = params["whh_f"].shape[0]
    fwd = _ref_lstm_dir(x, params["wih_f"], params["whh_f"], params["b_f"], H)
    bwd = _ref_lstm_dir(x[::-1], params["wih_b"], params["whh_b"],
                        params["b_b"], H)[::-1]
    return jnp.concatenate([fwd, bwd], axis=-1)


def init_params(key, num_in, num_hidden):
    """Deterministic init mirroring nn.LSTM param shapes (gate order i,f,g,o).

    Weights are stored transposed relative to PyTorch ((in, 4H) instead of
    (4H, in)); b_ih and b_hh are pre-summed into a single (1, 4H) bias.
    """
    bound = 1.0 / jnp.sqrt(num_hidden)
    ks = jax.random.split(key, 8)
    u = lambda k, shape: jax.random.uniform(
        k, shape, jnp.float32, minval=-bound, maxval=bound)
    return {
        "wih_f": u(ks[0], (num_in, 4 * num_hidden)),
        "whh_f": u(ks[1], (num_hidden, 4 * num_hidden)),
        "b_f": u(ks[2], (1, 4 * num_hidden)) + u(ks[3], (1, 4 * num_hidden)),
        "wih_b": u(ks[4], (num_in, 4 * num_hidden)),
        "whh_b": u(ks[5], (num_hidden, 4 * num_hidden)),
        "b_b": u(ks[6], (1, 4 * num_hidden)) + u(ks[7], (1, 4 * num_hidden)),
    }


if __name__ == "__main__":
    # NOTE: at B=2 every (B, .) tile is ~1/16 vreg-occupied and each MXU push
    # is ~1.5% row-utilized; if multiple sequences/layers exist, batch them
    # into B (>=8, ideally toward 128) before further in-kernel tuning.
    T, B, NUM_IN, HIDDEN = 8, 2, 16, 32

    key = jax.random.PRNGKey(0)
    kx, kp = jax.random.split(key)
    x = jax.random.normal(kx, (T, B, NUM_IN), jnp.float32)
    params = init_params(kp, NUM_IN, HIDDEN)

    # Pack weights once, outside the per-call jitted path.
    packed = pack_params(params)
    packed = jax.tree_util.tree_map(jax.block_until_ready, packed)

    fwd_fn = jax.jit(simple_lstm_forward)
    out = jax.block_until_ready(fwd_fn(x, packed))

    ref = simple_lstm_reference(x, params)
    assert out.shape == (T, B, 2 * HIDDEN), out.shape
    assert jnp.allclose(out, ref, atol=1e-5, rtol=1e-5), (
        float(jnp.max(jnp.abs(out - ref))))

    print("KERNEL_OK")
</pallas_src>

<mosaic_0001>
module attributes {stable_mosaic.version = 11 : i64} {
  func.func @bilstm_kernel(%arg0: memref<16x16xf32, #tpu.memory_space<vmem>>, %arg1: memref<16x256xf32, #tpu.memory_space<vmem>>, %arg2: memref<64x256xf32, #tpu.memory_space<vmem>>, %arg3: memref<1x256xf32, #tpu.memory_space<vmem>>, %arg4: memref<8x2x64xf32, #tpu.memory_space<vmem>>, %arg5: memref<16x256xf32, #tpu.memory_space<vmem>>) attributes {dimension_semantics = [], scalar_prefetch = 0 : i64, scratch_operands = 1 : i64, tpu.core_type = #tpu.core_type<tc>} {
    %c0 = arith.constant 0 : index
    %c0_0 = arith.constant 0 : index
    %0 = vector.load %arg0[%c0, %c0_0] : memref<16x16xf32, #tpu.memory_space<vmem>>, vector<16x16xf32>
    %c0_1 = arith.constant 0 : index
    %c0_2 = arith.constant 0 : index
    %1 = vector.load %arg1[%c0_1, %c0_2] : memref<16x256xf32, #tpu.memory_space<vmem>>, vector<16x256xf32>
    %cst = arith.constant dense<0.000000e+00> : vector<16x256xf32>
    %2 = tpu.matmul %0, %1, %cst {dimension_numbers = #tpu.dot_dimension_numbers<[1], [0], [0], [1], [0, 0, 1, 1], [], []>} : vector<16x16xf32>, vector<16x256xf32>, vector<16x256xf32> -> vector<16x256xf32>
    %c0_3 = arith.constant 0 : index
    %c0_4 = arith.constant 0 : index
    %3 = vector.load %arg3[%c0_3, %c0_4] : memref<1x256xf32, #tpu.memory_space<vmem>>, vector<1x256xf32>
    %4 = vector.broadcast %3 : vector<1x256xf32> to vector<16x256xf32>
    %5 = arith.addf %2, %4 : vector<16x256xf32>
    %c0_5 = arith.constant 0 : index
    %c0_6 = arith.constant 0 : index
    %6 = vector.load %arg5[%c0_5, %c0_6] : memref<16x256xf32, #tpu.memory_space<vmem>>, vector<16x256xf32>
    tpu.vector_store %arg5[%c0_5, %c0_6], %5 {strides = array<i32>} : memref<16x256xf32, #tpu.memory_space<vmem>>, vector<16x256xf32>,
    %7 = tpu.iota {dimensions = array<i32: 1>} : vector<2x256xi32>
    %c64_i32 = arith.constant 64 : i32
    %c0_i32 = arith.constant 0 : i32
    %8 = arith.cmpi eq, %c64_i32, %c0_i32 : i32
    %c1_i32 = arith.constant 1 : i32
    %9 = arith.select %8, %c1_i32, %c64_i32 : i32
    %10 = vector.broadcast %9 : i32 to vector<2x256xi32>
    %11 = arith.remsi %7, %10 : vector<2x256xi32>
    %c0_i32_7 = arith.constant 0 : i32
    %12 = vector.broadcast %c0_i32_7 : i32 to vector<2x256xi32>
    %13 = arith.cmpi ne, %11, %12 : vector<2x256xi32>
    %c0_i32_8 = arith.constant 0 : i32
    %14 = vector.broadcast %c0_i32_8 : i32 to vector<2x256xi32>
    %15 = arith.cmpi slt, %11, %14 : vector<2x256xi32>
    %c0_i32_9 = arith.constant 0 : i32
    %16 = arith.cmpi slt, %9, %c0_i32_9 : i32
    %17 = vector.broadcast %16 : i1 to vector<2x256xi1>
    %18 = vector.broadcast %17 : vector<2x256xi1> to vector<2x256xi1>
    %19 = arith.xori %15, %18 : vector<2x256xi1>
    %20 = arith.andi %19, %13 : vector<2x256xi1>
    %21 = vector.broadcast %9 : i32 to vector<2x256xi32>
    %22 = arith.addi %11, %21 : vector<2x256xi32>
    %23 = arith.select %20, %22, %11 : vector<2x256xi1>, vector<2x256xi32>
    %c32_i32 = arith.constant 32 : i32
    %24 = vector.broadcast %c32_i32 : i32 to vector<2x256xi32>
    %25 = arith.cmpi slt, %23, %24 : vector<2x256xi32>
    %cst_10 = arith.constant 0.000000e+00 : f32
    %26 = vector.broadcast %cst_10 : f32 to vector<2x64xf32>
    %cst_11 = arith.constant 0.000000e+00 : f32
    %27 = vector.broadcast %cst_11 : f32 to vector<2x64xf32>
    %c0_12 = arith.constant 0 : index
    %c0_13 = arith.constant 0 : index
    %28 = vector.load %arg2[%c0_12, %c0_13] : memref<64x256xf32, #tpu.memory_space<vmem>>, vector<64x256xf32>
    %cst_14 = arith.constant dense<0.000000e+00> : vector<2x256xf32>
    %29 = tpu.matmul %26, %28, %cst_14 {dimension_numbers = #tpu.dot_dimension_numbers<[1], [0], [0], [1], [0, 0, 1, 1], [], []>} : vector<2x64xf32>, vector<64x256xf32>, vector<2x256xf32> -> vector<2x256xf32>
    %c0_15 = arith.constant 0 : index
    %c0_16 = arith.constant 0 : index
    %30 = vector.load %arg5[%c0_15, %c0_16] : memref<16x256xf32, #tpu.memory_space<vmem>>, vector<2x256xf32>
    %c14 = arith.constant 14 : index
    %c0_17 = arith.constant 0 : index
    %31 = vector.load %arg5[%c14, %c0_17] : memref<16x256xf32, #tpu.memory_space<vmem>>, vector<2x256xf32>
    %32 = arith.select %25, %30, %31 : vector<2x256xi1>, vector<2x256xf32>
    %33 = arith.addf %32, %29 : vector<2x256xf32>
    %34 = vector.extract_strided_slice %33 {offsets = [0, 0], sizes = [2, 128], strides = [1, 1]} : vector<2x256xf32> to vector<2x128xf32>
    %cst_18 = arith.constant 5.000000e-01 : f32
    %35 = vector.broadcast %cst_18 : f32 to vector<2x128xf32>
    %36 = arith.mulf %35, %34 : vector<2x128xf32>
    %37 = math.tanh %36 : vector<2x128xf32>
    %cst_19 = arith.constant 5.000000e-01 : f32
    %38 = vector.broadcast %cst_19 : f32 to vector<2x128xf32>
    %39 = arith.mulf %38, %37 : vector<2x128xf32>
    %cst_20 = arith.constant 5.000000e-01 : f32
    %40 = vector.broadcast %cst_20 : f32 to vector<2x128xf32>
    %41 = arith.addf %39, %40 : vector<2x128xf32>
    %42 = vector.extract_strided_slice %41 {offsets = [0, 0], sizes = [2, 64], strides = [1, 1]} : vector<2x128xf32> to vector<2x64xf32>
    %43 = vector.extract_strided_slice %41 {offsets = [0, 64], sizes = [2, 64], strides = [1, 1]} : vector<2x128xf32> to vector<2x64xf32>
    %44 = vector.extract_strided_slice %33 {offsets = [0, 128], sizes = [2, 64], strides = [1, 1]} : vector<2x256xf32> to vector<2x64xf32>
    %45 = math.tanh %44 : vector<2x64xf32>
    %46 = vector.extract_strided_slice %33 {offsets = [0, 192], sizes = [2, 64], strides = [1, 1]} : vector<2x256xf32> to vector<2x64xf32>
    %cst_21 = arith.constant 5.000000e-01 : f32
    %47 = vector.broadcast %cst_21 : f32 to vector<2x64xf32>
    %48 = arith.mulf %47, %46 : vector<2x64xf32>
    %49 = math.tanh %48 : vector<2x64xf32>
    %cst_22 = arith.constant 5.000000e-01 : f32
    %50 = vector.broadcast %cst_22 : f32 to vector<2x64xf32>
    %51 = arith.mulf %50, %49 : vector<2x64xf32>
    %cst_23 = arith.constant 5.000000e-01 : f32
    %52 = vector.broadcast %cst_23 : f32 to vector<2x64xf32>
    %53 = arith.addf %51, %52 : vector<2x64xf32>
    %54 = arith.mulf %43, %27 : vector<2x64xf32>
    %55 = arith.mulf %42, %45 : vector<2x64xf32>
    %56 = arith.addf %54, %55 : vector<2x64xf32>
    %57 = math.tanh %56 : vector<2x64xf32>
    %58 = arith.mulf %53, %57 : vector<2x64xf32>
    %59 = vector.extract_strided_slice %58 {offsets = [0, 0], sizes = [2, 32], strides = [1, 1]} : vector<2x64xf32> to vector<2x32xf32>
    %c0_24 = arith.constant 0 : index
    %c0_25 = arith.constant 0 : index
    %c0_26 = arith.constant 0 : index
    %60 = vector.load %arg4[%c0_24, %c0_25, %c0_26] : memref<8x2x64xf32, #tpu.memory_space<vmem>>, vector<1x2x32xf32>
    %61 = vector.shape_cast %60 : vector<1x2x32xf32> to vector<2x32xf32>
    %62 = vector.shape_cast %59 : vector<2x32xf32> to vector<1x2x32xf32>
    tpu.vector_store %arg4[%c0_24, %c0_25, %c0_26], %62 {strides = array<i32>} : memref<8x2x64xf32, #tpu.memory_space<vmem>>, vector<1x2x32xf32>,
    %63 = vector.extract_strided_slice %58 {offsets = [0, 32], sizes = [2, 32], strides = [1, 1]} : vector<2x64xf32> to vector<2x32xf32>
    %c7 = arith.constant 7 : index
    %c0_27 = arith.constant 0 : index
    %c32 = arith.constant 32 : index
    %64 = vector.load %arg4[%c7, %c0_27, %c32] : memref<8x2x64xf32, #tpu.memory_space<vmem>>, vector<1x2x32xf32>
    %65 = vector.shape_cast %64 : vector<1x2x32xf32> to vector<2x32xf32>
    %66 = vector.shape_cast %63 : vector<2x32xf32> to vector<1x2x32xf32>
    tpu.vector_store %arg4[%c7, %c0_27, %c32], %66 {strides = array<i32>} : memref<8x2x64xf32, #tpu.memory_space<vmem>>, vector<1x2x32xf32>,
    %c0_28 = arith.constant 0 : index
    %c0_29 = arith.constant 0 : index
    %67 = vector.load %arg2[%c0_28, %c0_29] : memref<64x256xf32, #tpu.memory_space<vmem>>, vector<64x256xf32>
    %cst_30 = arith.constant dense<0.000000e+00> : vector<2x256xf32>
    %68 = tpu.matmul %58, %67, %cst_30 {dimension_numbers = #tpu.dot_dimension_numbers<[1], [0], [0], [1], [0, 0, 1, 1], [], []>} : vector<2x64xf32>, vector<64x256xf32>, vector<2x256xf32> -> vector<2x256xf32>
    %c2 = arith.constant 2 : index
    %c0_31 = arith.constant 0 : index
    %69 = vector.load %arg5[%c2, %c0_31] : memref<16x256xf32, #tpu.memory_space<vmem>>, vector<2x256xf32>
    %c12 = arith.constant 12 : index
    %c0_32 = arith.constant 0 : index
    %70 = vector.load %arg5[%c12, %c0_32] : memref<16x256xf32, #tpu.memory_space<vmem>>, vector<2x256xf32>
    %71 = arith.select %25, %69, %70 : vector<2x256xi1>, vector<2x256xf32>
    %72 = arith.addf %71, %68 : vector<2x256xf32>
    %73 = vector.extract_strided_slice %72 {offsets = [0, 0], sizes = [2, 128], strides = [1, 1]} : vector<2x256xf32> to vector<2x128xf32>
    %cst_33 = arith.constant 5.000000e-01 : f32
    %74 = vector.broadcast %cst_33 : f32 to vector<2x128xf32>
    %75 = arith.mulf %74, %73 : vector<2x128xf32>
    %76 = math.tanh %75 : vector<2x128xf32>
    %cst_34 = arith.constant 5.000000e-01 : f32
    %77 = vector.broadcast %cst_34 : f32 to vector<2x128xf32>
    %78 = arith.mulf %77, %76 : vector<2x128xf32>
    %cst_35 = arith.constant 5.000000e-01 : f32
    %79 = vector.broadcast %cst_35 : f32 to vector<2x128xf32>
    %80 = arith.addf %78, %79 : vector<2x128xf32>
    %81 = vector.extract_strided_slice %80 {offsets = [0, 0], sizes = [2, 64], strides = [1, 1]} : vector<2x128xf32> to vector<2x64xf32>
    %82 = vector.extract_strided_slice %80 {offsets = [0, 64], sizes = [2, 64], strides = [1, 1]} : vector<2x128xf32> to vector<2x64xf32>
    %83 = vector.extract_strided_slice %72 {offsets = [0, 128], sizes = [2, 64], strides = [1, 1]} : vector<2x256xf32> to vector<2x64xf32>
    %84 = math.tanh %83 : vector<2x64xf32>
    %85 = vector.extract_strided_slice %72 {offsets = [0, 192], sizes = [2, 64], strides = [1, 1]} : vector<2x256xf32> to vector<2x64xf32>
    %cst_36 = arith.constant 5.000000e-01 : f32
    %86 = vector.broadcast %cst_36 : f32 to vector<2x64xf32>
    %87 = arith.mulf %86, %85 : vector<2x64xf32>
    %88 = math.tanh %87 : vector<2x64xf32>
    %cst_37 = arith.constant 5.000000e-01 : f32
    %89 = vector.broadcast %cst_37 : f32 to vector<2x64xf32>
    %90 = arith.mulf %89, %88 : vector<2x64xf32>
    %cst_38 = arith.constant 5.000000e-01 : f32
    %91 = vector.broadcast %cst_38 : f32 to vector<2x64xf32>
    %92 = arith.addf %90, %91 : vector<2x64xf32>
    %93 = arith.mulf %82, %56 : vector<2x64xf32>
    %94 = arith.mulf %81, %84 : vector<2x64xf32>
    %95 = arith.addf %93, %94 : vector<2x64xf32>
    %96 = math.tanh %95 : vector<2x64xf32>
    %97 = arith.mulf %92, %96 : vector<2x64xf32>
    %98 = vector.extract_strided_slice %97 {offsets = [0, 0], sizes = [2, 32], strides = [1, 1]} : vector<2x64xf32> to vector<2x32xf32>
    %c1 = arith.constant 1 : index
    %c0_39 = arith.constant 0 : index
    %c0_40 = arith.constant 0 : index
    %99 = vector.load %arg4[%c1, %c0_39, %c0_40] : memref<8x2x64xf32, #tpu.memory_space<vmem>>, vector<1x2x32xf32>
    %100 = vector.shape_cast %99 : vector<1x2x32xf32> to vector<2x32xf32>
    %101 = vector.shape_cast %98 : vector<2x32xf32> to vector<1x2x32xf32>
    tpu.vector_store %arg4[%c1, %c0_39, %c0_40], %101 {strides = array<i32>} : memref<8x2x64xf32, #tpu.memory_space<vmem>>, vector<1x2x32xf32>,
    %102 = vector.extract_strided_slice %97 {offsets = [0, 32], sizes = [2, 32], strides = [1, 1]} : vector<2x64xf32> to vector<2x32xf32>
    %c6 = arith.constant 6 : index
    %c0_41 = arith.constant 0 : index
    %c32_42 = arith.constant 32 : index
    %103 = vector.load %arg4[%c6, %c0_41, %c32_42] : memref<8x2x64xf32, #tpu.memory_space<vmem>>, vector<1x2x32xf32>
    %104 = vector.shape_cast %103 : vector<1x2x32xf32> to vector<2x32xf32>
    %105 = vector.shape_cast %102 : vector<2x32xf32> to vector<1x2x32xf32>
    tpu.vector_store %arg4[%c6, %c0_41, %c32_42], %105 {strides = array<i32>} : memref<8x2x64xf32, #tpu.memory_space<vmem>>, vector<1x2x32xf32>,
    %c0_43 = arith.constant 0 : index
    %c0_44 = arith.constant 0 : index
    %106 = vector.load %arg2[%c0_43, %c0_44] : memref<64x256xf32, #tpu.memory_space<vmem>>, vector<64x256xf32>
    %cst_45 = arith.constant dense<0.000000e+00> : vector<2x256xf32>
    %107 = tpu.matmul %97, %106, %cst_45 {dimension_numbers = #tpu.dot_dimension_numbers<[1], [0], [0], [1], [0, 0, 1, 1], [], []>} : vector<2x64xf32>, vector<64x256xf32>, vector<2x256xf32> -> vector<2x256xf32>
    %c4 = arith.constant 4 : index
    %c0_46 = arith.constant 0 : index
    %108 = vector.load %arg5[%c4, %c0_46] : memref<16x256xf32, #tpu.memory_space<vmem>>, vector<2x256xf32>
    %c10 = arith.constant 10 : index
    %c0_47 = arith.constant 0 : index
    %109 = vector.load %arg5[%c10, %c0_47] : memref<16x256xf32, #tpu.memory_space<vmem>>, vector<2x256xf32>
    %110 = arith.select %25, %108, %109 : vector<2x256xi1>, vector<2x256xf32>
    %111 = arith.addf %110, %107 : vector<2x256xf32>
    %112 = vector.extract_strided_slice %111 {offsets = [0, 0], sizes = [2, 128], strides = [1, 1]} : vector<2x256xf32> to vector<2x128xf32>
    %cst_48 = arith.constant 5.000000e-01 : f32
    %113 = vector.broadcast %cst_48 : f32 to vector<2x128xf32>
    %114 = arith.mulf %113, %112 : vector<2x128xf32>
    %115 = math.tanh %114 : vector<2x128xf32>
    %cst_49 = arith.constant 5.000000e-01 : f32
    %116 = vector.broadcast %cst_49 : f32 to vector<2x128xf32>
    %117 = arith.mulf %116, %115 : vector<2x128xf32>
    %cst_50 = arith.constant 5.000000e-01 : f32
    %118 = vector.broadcast %cst_50 : f32 to vector<2x128xf32>
    %119 = arith.addf %117, %118 : vector<2x128xf32>
    %120 = vector.extract_strided_slice %119 {offsets = [0, 0], sizes = [2, 64], strides = [1, 1]} : vector<2x128xf32> to vector<2x64xf32>
    %121 = vector.extract_strided_slice %119 {offsets = [0, 64], sizes = [2, 64], strides = [1, 1]} : vector<2x128xf32> to vector<2x64xf32>
    %122 = vector.extract_strided_slice %111 {offsets = [0, 128], sizes = [2, 64], strides = [1, 1]} : vector<2x256xf32> to vector<2x64xf32>
    %123 = math.tanh %122 : vector<2x64xf32>
    %124 = vector.extract_strided_slice %111 {offsets = [0, 192], sizes = [2, 64], strides = [1, 1]} : vector<2x256xf32> to vector<2x64xf32>
    %cst_51 = arith.constant 5.000000e-01 : f32
    %125 = vector.broadcast %cst_51 : f32 to vector<2x64xf32>
    %126 = arith.mulf %125, %124 : vector<2x64xf32>
    %127 = math.tanh %126 : vector<2x64xf32>
    %cst_52 = arith.constant 5.000000e-01 : f32
    %128 = vector.broadcast %cst_52 : f32 to vector<2x64xf32>
    %129 = arith.mulf %128, %127 : vector<2x64xf32>
    %cst_53 = arith.constant 5.000000e-01 : f32
    %130 = vector.broadcast %cst_53 : f32 to vector<2x64xf32>
    %131 = arith.addf %129, %130 : vector<2x64xf32>
    %132 = arith.mulf %121, %95 : vector<2x64xf32>
    %133 = arith.mulf %120, %123 : vector<2x64xf32>
    %134 = arith.addf %132, %133 : vector<2x64xf32>
    %135 = math.tanh %134 : vector<2x64xf32>
    %136 = arith.mulf %131, %135 : vector<2x64xf32>
    %137 = vector.extract_strided_slice %136 {offsets = [0, 0], sizes = [2, 32], strides = [1, 1]} : vector<2x64xf32> to vector<2x32xf32>
    %c2_54 = arith.constant 2 : index
    %c0_55 = arith.constant 0 : index
    %c0_56 = arith.constant 0 : index
    %138 = vector.load %arg4[%c2_54, %c0_55, %c0_56] : memref<8x2x64xf32, #tpu.memory_space<vmem>>, vector<1x2x32xf32>
    %139 = vector.shape_cast %138 : vector<1x2x32xf32> to vector<2x32xf32>
    %140 = vector.shape_cast %137 : vector<2x32xf32> to vector<1x2x32xf32>
    tpu.vector_store %arg4[%c2_54, %c0_55, %c0_56], %140 {strides = array<i32>} : memref<8x2x64xf32, #tpu.memory_space<vmem>>, vector<1x2x32xf32>,
    %141 = vector.extract_strided_slice %136 {offsets = [0, 32], sizes = [2, 32], strides = [1, 1]} : vector<2x64xf32> to vector<2x32xf32>
    %c5 = arith.constant 5 : index
    %c0_57 = arith.constant 0 : index
    %c32_58 = arith.constant 32 : index
    %142 = vector.load %arg4[%c5, %c0_57, %c32_58] : memref<8x2x64xf32, #tpu.memory_space<vmem>>, vector<1x2x32xf32>
    %143 = vector.shape_cast %142 : vector<1x2x32xf32> to vector<2x32xf32>
    %144 = vector.shape_cast %141 : vector<2x32xf32> to vector<1x2x32xf32>
    tpu.vector_store %arg4[%c5, %c0_57, %c32_58], %144 {strides = array<i32>} : memref<8x2x64xf32, #tpu.memory_space<vmem>>, vector<1x2x32xf32>,
    %c0_59 = arith.constant 0 : index
    %c0_60 = arith.constant 0 : index
    %145 = vector.load %arg2[%c0_59, %c0_60] : memref<64x256xf32, #tpu.memory_space<vmem>>, vector<64x256xf32>
    %cst_61 = arith.constant dense<0.000000e+00> : vector<2x256xf32>
    %146 = tpu.matmul %136, %145, %cst_61 {dimension_numbers = #tpu.dot_dimension_numbers<[1], [0], [0], [1], [0, 0, 1, 1], [], []>} : vector<2x64xf32>, vector<64x256xf32>, vector<2x256xf32> -> vector<2x256xf32>
    %c6_62 = arith.constant 6 : index
    %c0_63 = arith.constant 0 : index
    %147 = vector.load %arg5[%c6_62, %c0_63] : memref<16x256xf32, #tpu.memory_space<vmem>>, vector<2x256xf32>
    %c8 = arith.constant 8 : index
    %c0_64 = arith.constant 0 : index
    %148 = vector.load %arg5[%c8, %c0_64] : memref<16x256xf32, #tpu.memory_space<vmem>>, vector<2x256xf32>
    %149 = arith.select %25, %147, %148 : vector<2x256xi1>, vector<2x256xf32>
    %150 = arith.addf %149, %146 : vector<2x256xf32>
    %151 = vector.extract_strided_slice %150 {offsets = [0, 0], sizes = [2, 128], strides = [1, 1]} : vector<2x256xf32> to vector<2x128xf32>
    %cst_65 = arith.constant 5.000000e-01 : f32
    %152 = vector.broadcast %cst_65 : f32 to vector<2x128xf32>
    %153 = arith.mulf %152, %151 : vector<2x128xf32>
    %154 = math.tanh %153 : vector<2x128xf32>
    %cst_66 = arith.constant 5.000000e-01 : f32
    %155 = vector.broadcast %cst_66 : f32 to vector<2x128xf32>
    %156 = arith.mulf %155, %154 : vector<2x128xf32>
    %cst_67 = arith.constant 5.000000e-01 : f32
    %157 = vector.broadcast %cst_67 : f32 to vector<2x128xf32>
    %158 = arith.addf %156, %157 : vector<2x128xf32>
    %159 = vector.extract_strided_slice %158 {offsets = [0, 0], sizes = [2, 64], strides = [1, 1]} : vector<2x128xf32> to vector<2x64xf32>
    %160 = vector.extract_strided_slice %158 {offsets = [0, 64], sizes = [2, 64], strides = [1, 1]} : vector<2x128xf32> to vector<2x64xf32>
    %161 = vector.extract_strided_slice %150 {offsets = [0, 128], sizes = [2, 64], strides = [1, 1]} : vector<2x256xf32> to vector<2x64xf32>
    %162 = math.tanh %161 : vector<2x64xf32>
    %163 = vector.extract_strided_slice %150 {offsets = [0, 192], sizes = [2, 64], strides = [1, 1]} : vector<2x256xf32> to vector<2x64xf32>
    %cst_68 = arith.constant 5.000000e-01 : f32
    %164 = vector.broadcast %cst_68 : f32 to vector<2x64xf32>
    %165 = arith.mulf %164, %163 : vector<2x64xf32>
    %166 = math.tanh %165 : vector<2x64xf32>
    %cst_69 = arith.constant 5.000000e-01 : f32
    %167 = vector.broadcast %cst_69 : f32 to vector<2x64xf32>
    %168 = arith.mulf %167, %166 : vector<2x64xf32>
    %cst_70 = arith.constant 5.000000e-01 : f32
    %169 = vector.broadcast %cst_70 : f32 to vector<2x64xf32>
    %170 = arith.addf %168, %169 : vector<2x64xf32>
    %171 = arith.mulf %160, %134 : vector<2x64xf32>
    %172 = arith.mulf %159, %162 : vector<2x64xf32>
    %173 = arith.addf %171, %172 : vector<2x64xf32>
    %174 = math.tanh %173 : vector<2x64xf32>
    %175 = arith.mulf %170, %174 : vector<2x64xf32>
    %176 = vector.extract_strided_slice %175 {offsets = [0, 0], sizes = [2, 32], strides = [1, 1]} : vector<2x64xf32> to vector<2x32xf32>
    %c3 = arith.constant 3 : index
    %c0_71 = arith.constant 0 : index
    %c0_72 = arith.constant 0 : index
    %177 = vector.load %arg4[%c3, %c0_71, %c0_72] : memref<8x2x64xf32, #tpu.memory_space<vmem>>, vector<1x2x32xf32>
    %178 = vector.shape_cast %177 : vector<1x2x32xf32> to vector<2x32xf32>
    %179 = vector.shape_cast %176 : vector<2x32xf32> to vector<1x2x32xf32>
    tpu.vector_store %arg4[%c3, %c0_71, %c0_72], %179 {strides = array<i32>} : memref<8x2x64xf32, #tpu.memory_space<vmem>>, vector<1x2x32xf32>,
    %180 = vector.extract_strided_slice %175 {offsets = [0, 32], sizes = [2, 32], strides = [1, 1]} : vector<2x64xf32> to vector<2x32xf32>
    %c4_73 = arith.constant 4 : index
    %c0_74 = arith.constant 0 : index
    %c32_75 = arith.constant 32 : index
    %181 = vector.load %arg4[%c4_73, %c0_74, %c32_75] : memref<8x2x64xf32, #tpu.memory_space<vmem>>, vector<1x2x32xf32>
    %182 = vector.shape_cast %181 : vector<1x2x32xf32> to vector<2x32xf32>
    %183 = vector.shape_cast %180 : vector<2x32xf32> to vector<1x2x32xf32>
    tpu.vector_store %arg4[%c4_73, %c0_74, %c32_75], %183 {strides = array<i32>} : memref<8x2x64xf32, #tpu.memory_space<vmem>>, vector<1x2x32xf32>,
    %c0_76 = arith.constant 0 : index
    %c0_77 = arith.constant 0 : index
    %184 = vector.load %arg2[%c0_76, %c0_77] : memref<64x256xf32, #tpu.memory_space<vmem>>, vector<64x256xf32>
    %cst_78 = arith.constant dense<0.000000e+00> : vector<2x256xf32>
    %185 = tpu.matmul %175, %184, %cst_78 {dimension_numbers = #tpu.dot_dimension_numbers<[1], [0], [0], [1], [0, 0, 1, 1], [], []>} : vector<2x64xf32>, vector<64x256xf32>, vector<2x256xf32> -> vector<2x256xf32>
    %c8_79 = arith.constant 8 : index
    %c0_80 = arith.constant 0 : index
    %186 = vector.load %arg5[%c8_79, %c0_80] : memref<16x256xf32, #tpu.memory_space<vmem>>, vector<2x256xf32>
    %c6_81 = arith.constant 6 : index
    %c0_82 = arith.constant 0 : index
    %187 = vector.load %arg5[%c6_81, %c0_82] : memref<16x256xf32, #tpu.memory_space<vmem>>, vector<2x256xf32>
    %188 = arith.select %25, %186, %187 : vector<2x256xi1>, vector<2x256xf32>
    %189 = arith.addf %188, %185 : vector<2x256xf32>
    %190 = vector.extract_strided_slice %189 {offsets = [0, 0], sizes = [2, 128], strides = [1, 1]} : vector<2x256xf32> to vector<2x128xf32>
    %cst_83 = arith.constant 5.000000e-01 : f32
    %191 = vector.broadcast %cst_83 : f32 to vector<2x128xf32>
    %192 = arith.mulf %191, %190 : vector<2x128xf32>
    %193 = math.tanh %192 : vector<2x128xf32>
    %cst_84 = arith.constant 5.000000e-01 : f32
    %194 = vector.broadcast %cst_84 : f32 to vector<2x128xf32>
    %195 = arith.mulf %194, %193 : vector<2x128xf32>
    %cst_85 = arith.constant 5.000000e-01 : f32
    %196 = vector.broadcast %cst_85 : f32 to vector<2x128xf32>
    %197 = arith.addf %195, %196 : vector<2x128xf32>
    %198 = vector.extract_strided_slice %197 {offsets = [0, 0], sizes = [2, 64], strides = [1, 1]} : vector<2x128xf32> to vector<2x64xf32>
    %199 = vector.extract_strided_slice %197 {offsets = [0, 64], sizes = [2, 64], strides = [1, 1]} : vector<2x128xf32> to vector<2x64xf32>
    %200 = vector.extract_strided_slice %189 {offsets = [0, 128], sizes = [2, 64], strides = [1, 1]} : vector<2x256xf32> to vector<2x64xf32>
    %201 = math.tanh %200 : vector<2x64xf32>
    %202 = vector.extract_strided_slice %189 {offsets = [0, 192], sizes = [2, 64], strides = [1, 1]} : vector<2x256xf32> to vector<2x64xf32>
    %cst_86 = arith.constant 5.000000e-01 : f32
    %203 = vector.broadcast %cst_86 : f32 to vector<2x64xf32>
    %204 = arith.mulf %203, %202 : vector<2x64xf32>
    %205 = math.tanh %204 : vector<2x64xf32>
    %cst_87 = arith.constant 5.000000e-01 : f32
    %206 = vector.broadcast %cst_87 : f32 to vector<2x64xf32>
    %207 = arith.mulf %206, %205 : vector<2x64xf32>
    %cst_88 = arith.constant 5.000000e-01 : f32
    %208 = vector.broadcast %cst_88 : f32 to vector<2x64xf32>
    %209 = arith.addf %207, %208 : vector<2x64xf32>
    %210 = arith.mulf %199, %173 : vector<2x64xf32>
    %211 = arith.mulf %198, %201 : vector<2x64xf32>
    %212 = arith.addf %210, %211 : vector<2x64xf32>
    %213 = math.tanh %212 : vector<2x64xf32>
    %214 = arith.mulf %209, %213 : vector<2x64xf32>
    %215 = vector.extract_strided_slice %214 {offsets = [0, 0], sizes = [2, 32], strides = [1, 1]} : vector<2x64xf32> to vector<2x32xf32>
    %c4_89 = arith.constant 4 : index
    %c0_90 = arith.constant 0 : index
    %c0_91 = arith.constant 0 : index
    %216 = vector.load %arg4[%c4_89, %c0_90, %c0_91] : memref<8x2x64xf32, #tpu.memory_space<vmem>>, vector<1x2x32xf32>
    %217 = vector.shape_cast %216 : vector<1x2x32xf32> to vector<2x32xf32>
    %218 = vector.shape_cast %215 : vector<2x32xf32> to vector<1x2x32xf32>
    tpu.vector_store %arg4[%c4_89, %c0_90, %c0_91], %218 {strides = array<i32>} : memref<8x2x64xf32, #tpu.memory_space<vmem>>, vector<1x2x32xf32>,
    %219 = vector.extract_strided_slice %214 {offsets = [0, 32], sizes = [2, 32], strides = [1, 1]} : vector<2x64xf32> to vector<2x32xf32>
    %c3_92 = arith.constant 3 : index
    %c0_93 = arith.constant 0 : index
    %c32_94 = arith.constant 32 : index
    %220 = vector.load %arg4[%c3_92, %c0_93, %c32_94] : memref<8x2x64xf32, #tpu.memory_space<vmem>>, vector<1x2x32xf32>
    %221 = vector.shape_cast %220 : vector<1x2x32xf32> to vector<2x32xf32>
    %222 = vector.shape_cast %219 : vector<2x32xf32> to vector<1x2x32xf32>
    tpu.vector_store %arg4[%c3_92, %c0_93, %c32_94], %222 {strides = array<i32>} : memref<8x2x64xf32, #tpu.memory_space<vmem>>, vector<1x2x32xf32>,
    %c0_95 = arith.constant 0 : index
    %c0_96 = arith.constant 0 : index
    %223 = vector.load %arg2[%c0_95, %c0_96] : memref<64x256xf32, #tpu.memory_space<vmem>>, vector<64x256xf32>
    %cst_97 = arith.constant dense<0.000000e+00> : vector<2x256xf32>
    %224 = tpu.matmul %214, %223, %cst_97 {dimension_numbers = #tpu.dot_dimension_numbers<[1], [0], [0], [1], [0, 0, 1, 1], [], []>} : vector<2x64xf32>, vector<64x256xf32>, vector<2x256xf32> -> vector<2x256xf32>
    %c10_98 = arith.constant 10 : index
    %c0_99 = arith.constant 0 : index
    %225 = vector.load %arg5[%c10_98, %c0_99] : memref<16x256xf32, #tpu.memory_space<vmem>>, vector<2x256xf32>
    %c4_100 = arith.constant 4 : index
    %c0_101 = arith.constant 0 : index
    %226 = vector.load %arg5[%c4_100, %c0_101] : memref<16x256xf32, #tpu.memory_space<vmem>>, vector<2x256xf32>
    %227 = arith.select %25, %225, %226 : vector<2x256xi1>, vector<2x256xf32>
    %228 = arith.addf %227, %224 : vector<2x256xf32>
    %229 = vector.extract_strided_slice %228 {offsets = [0, 0], sizes = [2, 128], strides = [1, 1]} : vector<2x256xf32> to vector<2x128xf32>
    %cst_102 = arith.constant 5.000000e-01 : f32
    %230 = vector.broadcast %cst_102 : f32 to vector<2x128xf32>
    %231 = arith.mulf %230, %229 : vector<2x128xf32>
    %232 = math.tanh %231 : vector<2x128xf32>
    %cst_103 = arith.constant 5.000000e-01 : f32
    %233 = vector.broadcast %cst_103 : f32 to vector<2x128xf32>
    %234 = arith.mulf %233, %232 : vector<2x128xf32>
    %cst_104 = arith.constant 5.000000e-01 : f32
    %235 = vector.broadcast %cst_104 : f32 to vector<2x128xf32>
    %236 = arith.addf %234, %235 : vector<2x128xf32>
    %237 = vector.extract_strided_slice %236 {offsets = [0, 0], sizes = [2, 64], strides = [1, 1]} : vector<2x128xf32> to vector<2x64xf32>
    %238 = vector.extract_strided_slice %236 {offsets = [0, 64], sizes = [2, 64], strides = [1, 1]} : vector<2x128xf32> to vector<2x64xf32>
    %239 = vector.extract_strided_slice %228 {offsets = [0, 128], sizes = [2, 64], strides = [1, 1]} : vector<2x256xf32> to vector<2x64xf32>
    %240 = math.tanh %239 : vector<2x64xf32>
    %241 = vector.extract_strided_slice %228 {offsets = [0, 192], sizes = [2, 64], strides = [1, 1]} : vector<2x256xf32> to vector<2x64xf32>
    %cst_105 = arith.constant 5.000000e-01 : f32
    %242 = vector.broadcast %cst_105 : f32 to vector<2x64xf32>
    %243 = arith.mulf %242, %241 : vector<2x64xf32>
    %244 = math.tanh %243 : vector<2x64xf32>
    %cst_106 = arith.constant 5.000000e-01 : f32
    %245 = vector.broadcast %cst_106 : f32 to vector<2x64xf32>
    %246 = arith.mulf %245, %244 : vector<2x64xf32>
    %cst_107 = arith.constant 5.000000e-01 : f32
    %247 = vector.broadcast %cst_107 : f32 to vector<2x64xf32>
    %248 = arith.addf %246, %247 : vector<2x64xf32>
    %249 = arith.mulf %238, %212 : vector<2x64xf32>
    %250 = arith.mulf %237, %240 : vector<2x64xf32>
    %251 = arith.addf %249, %250 : vector<2x64xf32>
    %252 = math.tanh %251 : vector<2x64xf32>
    %253 = arith.mulf %248, %252 : vector<2x64xf32>
    %254 = vector.extract_strided_slice %253 {offsets = [0, 0], sizes = [2, 32], strides = [1, 1]} : vector<2x64xf32> to vector<2x32xf32>
    %c5_108 = arith.constant 5 : index
    %c0_109 = arith.constant 0 : index
    %c0_110 = arith.constant 0 : index
    %255 = vector.load %arg4[%c5_108, %c0_109, %c0_110] : memref<8x2x64xf32, #tpu.memory_space<vmem>>, vector<1x2x32xf32>
    %256 = vector.shape_cast %255 : vector<1x2x32xf32> to vector<2x32xf32>
    %257 = vector.shape_cast %254 : vector<2x32xf32> to vector<1x2x32xf32>
    tpu.vector_store %arg4[%c5_108, %c0_109, %c0_110], %257 {strides = array<i32>} : memref<8x2x64xf32, #tpu.memory_space<vmem>>, vector<1x2x32xf32>,
    %258 = vector.extract_strided_slice %253 {offsets = [0, 32], sizes = [2, 32], strides = [1, 1]} : vector<2x64xf32> to vector<2x32xf32>
    %c2_111 = arith.constant 2 : index
    %c0_112 = arith.constant 0 : index
    %c32_113 = arith.constant 32 : index
    %259 = vector.load %arg4[%c2_111, %c0_112, %c32_113] : memref<8x2x64xf32, #tpu.memory_space<vmem>>, vector<1x2x32xf32>
    %260 = vector.shape_cast %259 : vector<1x2x32xf32> to vector<2x32xf32>
    %261 = vector.shape_cast %258 : vector<2x32xf32> to vector<1x2x32xf32>
    tpu.vector_store %arg4[%c2_111, %c0_112, %c32_113], %261 {strides = array<i32>} : memref<8x2x64xf32, #tpu.memory_space<vmem>>, vector<1x2x32xf32>,
    %c0_114 = arith.constant 0 : index
    %c0_115 = arith.constant 0 : index
    %262 = vector.load %arg2[%c0_114, %c0_115] : memref<64x256xf32, #tpu.memory_space<vmem>>, vector<64x256xf32>
    %cst_116 = arith.constant dense<0.000000e+00> : vector<2x256xf32>
    %263 = tpu.matmul %253, %262, %cst_116 {dimension_numbers = #tpu.dot_dimension_numbers<[1], [0], [0], [1], [0, 0, 1, 1], [], []>} : vector<2x64xf32>, vector<64x256xf32>, vector<2x256xf32> -> vector<2x256xf32>
    %c12_117 = arith.constant 12 : index
    %c0_118 = arith.constant 0 : index
    %264 = vector.load %arg5[%c12_117, %c0_118] : memref<16x256xf32, #tpu.memory_space<vmem>>, vector<2x256xf32>
    %c2_119 = arith.constant 2 : index
    %c0_120 = arith.constant 0 : index
    %265 = vector.load %arg5[%c2_119, %c0_120] : memref<16x256xf32, #tpu.memory_space<vmem>>, vector<2x256xf32>
    %266 = arith.select %25, %264, %265 : vector<2x256xi1>, vector<2x256xf32>
    %267 = arith.addf %266, %263 : vector<2x256xf32>
    %268 = vector.extract_strided_slice %267 {offsets = [0, 0], sizes = [2, 128], strides = [1, 1]} : vector<2x256xf32> to vector<2x128xf32>
    %cst_121 = arith.constant 5.000000e-01 : f32
    %269 = vector.broadcast %cst_121 : f32 to vector<2x128xf32>
    %270 = arith.mulf %269, %268 : vector<2x128xf32>
    %271 = math.tanh %270 : vector<2x128xf32>
    %cst_122 = arith.constant 5.000000e-01 : f32
    %272 = vector.broadcast %cst_122 : f32 to vector<2x128xf32>
    %273 = arith.mulf %272, %271 : vector<2x128xf32>
    %cst_123 = arith.constant 5.000000e-01 : f32
    %274 = vector.broadcast %cst_123 : f32 to vector<2x128xf32>
    %275 = arith.addf %273, %274 : vector<2x128xf32>
    %276 = vector.extract_strided_slice %275 {offsets = [0, 0], sizes = [2, 64], strides = [1, 1]} : vector<2x128xf32> to vector<2x64xf32>
    %277 = vector.extract_strided_slice %275 {offsets = [0, 64], sizes = [2, 64], strides = [1, 1]} : vector<2x128xf32> to vector<2x64xf32>
    %278 = vector.extract_strided_slice %267 {offsets = [0, 128], sizes = [2, 64], strides = [1, 1]} : vector<2x256xf32> to vector<2x64xf32>
    %279 = math.tanh %278 : vector<2x64xf32>
    %280 = vector.extract_strided_slice %267 {offsets = [0, 192], sizes = [2, 64], strides = [1, 1]} : vector<2x256xf32> to vector<2x64xf32>
    %cst_124 = arith.constant 5.000000e-01 : f32
    %281 = vector.broadcast %cst_124 : f32 to vector<2x64xf32>
    %282 = arith.mulf %281, %280 : vector<2x64xf32>
    %283 = math.tanh %282 : vector<2x64xf32>
    %cst_125 = arith.constant 5.000000e-01 : f32
    %284 = vector.broadcast %cst_125 : f32 to vector<2x64xf32>
    %285 = arith.mulf %284, %283 : vector<2x64xf32>
    %cst_126 = arith.constant 5.000000e-01 : f32
    %286 = vector.broadcast %cst_126 : f32 to vector<2x64xf32>
    %287 = arith.addf %285, %286 : vector<2x64xf32>
    %288 = arith.mulf %277, %251 : vector<2x64xf32>
    %289 = arith.mulf %276, %279 : vector<2x64xf32>
    %290 = arith.addf %288, %289 : vector<2x64xf32>
    %291 = math.tanh %290 : vector<2x64xf32>
    %292 = arith.mulf %287, %291 : vector<2x64xf32>
    %293 = vector.extract_strided_slice %292 {offsets = [0, 0], sizes = [2, 32], strides = [1, 1]} : vector<2x64xf32> to vector<2x32xf32>
    %c6_127 = arith.constant 6 : index
    %c0_128 = arith.constant 0 : index
    %c0_129 = arith.constant 0 : index
    %294 = vector.load %arg4[%c6_127, %c0_128, %c0_129] : memref<8x2x64xf32, #tpu.memory_space<vmem>>, vector<1x2x32xf32>
    %295 = vector.shape_cast %294 : vector<1x2x32xf32> to vector<2x32xf32>
    %296 = vector.shape_cast %293 : vector<2x32xf32> to vector<1x2x32xf32>
    tpu.vector_store %arg4[%c6_127, %c0_128, %c0_129], %296 {strides = array<i32>} : memref<8x2x64xf32, #tpu.memory_space<vmem>>, vector<1x2x32xf32>,
    %297 = vector.extract_strided_slice %292 {offsets = [0, 32], sizes = [2, 32], strides = [1, 1]} : vector<2x64xf32> to vector<2x32xf32>
    %c1_130 = arith.constant 1 : index
    %c0_131 = arith.constant 0 : index
    %c32_132 = arith.constant 32 : index
    %298 = vector.load %arg4[%c1_130, %c0_131, %c32_132] : memref<8x2x64xf32, #tpu.memory_space<vmem>>, vector<1x2x32xf32>
    %299 = vector.shape_cast %298 : vector<1x2x32xf32> to vector<2x32xf32>
    %300 = vector.shape_cast %297 : vector<2x32xf32> to vector<1x2x32xf32>
    tpu.vector_store %arg4[%c1_130, %c0_131, %c32_132], %300 {strides = array<i32>} : memref<8x2x64xf32, #tpu.memory_space<vmem>>, vector<1x2x32xf32>,
    %c0_133 = arith.constant 0 : index
    %c0_134 = arith.constant 0 : index
    %301 = vector.load %arg2[%c0_133, %c0_134] : memref<64x256xf32, #tpu.memory_space<vmem>>, vector<64x256xf32>
    %cst_135 = arith.constant dense<0.000000e+00> : vector<2x256xf32>
    %302 = tpu.matmul %292, %301, %cst_135 {dimension_numbers = #tpu.dot_dimension_numbers<[1], [0], [0], [1], [0, 0, 1, 1], [], []>} : vector<2x64xf32>, vector<64x256xf32>, vector<2x256xf32> -> vector<2x256xf32>
    %c14_136 = arith.constant 14 : index
    %c0_137 = arith.constant 0 : index
    %303 = vector.load %arg5[%c14_136, %c0_137] : memref<16x256xf32, #tpu.memory_space<vmem>>, vector<2x256xf32>
    %c0_138 = arith.constant 0 : index
    %c0_139 = arith.constant 0 : index
    %304 = vector.load %arg5[%c0_138, %c0_139] : memref<16x256xf32, #tpu.memory_space<vmem>>, vector<2x256xf32>
    %305 = arith.select %25, %303, %304 : vector<2x256xi1>, vector<2x256xf32>
    %306 = arith.addf %305, %302 : vector<2x256xf32>
    %307 = vector.extract_strided_slice %306 {offsets = [0, 0], sizes = [2, 128], strides = [1, 1]} : vector<2x256xf32> to vector<2x128xf32>
    %cst_140 = arith.constant 5.000000e-01 : f32
    %308 = vector.broadcast %cst_140 : f32 to vector<2x128xf32>
    %309 = arith.mulf %308, %307 : vector<2x128xf32>
    %310 = math.tanh %309 : vector<2x128xf32>
    %cst_141 = arith.constant 5.000000e-01 : f32
    %311 = vector.broadcast %cst_141 : f32 to vector<2x128xf32>
    %312 = arith.mulf %311, %310 : vector<2x128xf32>
    %cst_142 = arith.constant 5.000000e-01 : f32
    %313 = vector.broadcast %cst_142 : f32 to vector<2x128xf32>
    %314 = arith.addf %312, %313 : vector<2x128xf32>
    %315 = vector.extract_strided_slice %314 {offsets = [0, 0], sizes = [2, 64], strides = [1, 1]} : vector<2x128xf32> to vector<2x64xf32>
    %316 = vector.extract_strided_slice %314 {offsets = [0, 64], sizes = [2, 64], strides = [1, 1]} : vector<2x128xf32> to vector<2x64xf32>
    %317 = vector.extract_strided_slice %306 {offsets = [0, 128], sizes = [2, 64], strides = [1, 1]} : vector<2x256xf32> to vector<2x64xf32>
    %318 = math.tanh %317 : vector<2x64xf32>
    %319 = vector.extract_strided_slice %306 {offsets = [0, 192], sizes = [2, 64], strides = [1, 1]} : vector<2x256xf32> to vector<2x64xf32>
    %cst_143 = arith.constant 5.000000e-01 : f32
    %320 = vector.broadcast %cst_143 : f32 to vector<2x64xf32>
    %321 = arith.mulf %320, %319 : vector<2x64xf32>
    %322 = math.tanh %321 : vector<2x64xf32>
    %cst_144 = arith.constant 5.000000e-01 : f32
    %323 = vector.broadcast %cst_144 : f32 to vector<2x64xf32>
    %324 = arith.mulf %323, %322 : vector<2x64xf32>
    %cst_145 = arith.constant 5.000000e-01 : f32
    %325 = vector.broadcast %cst_145 : f32 to vector<2x64xf32>
    %326 = arith.addf %324, %325 : vector<2x64xf32>
    %327 = arith.mulf %316, %290 : vector<2x64xf32>
    %328 = arith.mulf %315, %318 : vector<2x64xf32>
    %329 = arith.addf %327, %328 : vector<2x64xf32>
    %330 = math.tanh %329 : vector<2x64xf32>
    %331 = arith.mulf %326, %330 : vector<2x64xf32>
    %332 = vector.extract_strided_slice %331 {offsets = [0, 0], sizes = [2, 32], strides = [1, 1]} : vector<2x64xf32> to vector<2x32xf32>
    %c7_146 = arith.constant 7 : index
    %c0_147 = arith.constant 0 : index
    %c0_148 = arith.constant 0 : index
    %333 = vector.load %arg4[%c7_146, %c0_147, %c0_148] : memref<8x2x64xf32, #tpu.memory_space<vmem>>, vector<1x2x32xf32>
    %334 = vector.shape_cast %333 : vector<1x2x32xf32> to vector<2x32xf32>
    %335 = vector.shape_cast %332 : vector<2x32xf32> to vector<1x2x32xf32>
    tpu.vector_store %arg4[%c7_146, %c0_147, %c0_148], %335 {strides = array<i32>} : memref<8x2x64xf32, #tpu.memory_space<vmem>>, vector<1x2x32xf32>,
    %336 = vector.extract_strided_slice %331 {offsets = [0, 32], sizes = [2, 32], strides = [1, 1]} : vector<2x64xf32> to vector<2x32xf32>
    %c0_149 = arith.constant 0 : index
    %c0_150 = arith.constant 0 : index
    %c32_151 = arith.constant 32 : index
    %337 = vector.load %arg4[%c0_149, %c0_150, %c32_151] : memref<8x2x64xf32, #tpu.memory_space<vmem>>, vector<1x2x32xf32>
    %338 = vector.shape_cast %337 : vector<1x2x32xf32> to vector<2x32xf32>
    %339 = vector.shape_cast %336 : vector<2x32xf32> to vector<1x2x32xf32>
    tpu.vector_store %arg4[%c0_149, %c0_150, %c32_151], %339 {strides = array<i32>} : memref<8x2x64xf32, #tpu.memory_space<vmem>>, vector<1x2x32xf32>,
    return
  }
}

</mosaic_0001>

<bundles_post_ra>
// kernel: simple_lstm_forward.1
= control target key start
LH: loop header
LB: loop body
LE: loop exit
PB: predicated region body
PF: predicated region fallthrough
CT: control target
= control target key end

     0   :  { %9 = vsyncpa [#allocation4], 0  ;;  %s1920_s0 = inlined_call_operand.hbm [shape: f32[16,16], index: 0, kind: input, shape index: {}]   ;;  %s1921_s1 = inlined_call_operand.hbm [shape: f32[16,256], index: 1, kind: input, shape index: {}]   ;;  %s1922_s2 = inlined_call_operand.hbm [shape: f32[64,256], index: 2, kind: input, shape index: {}]   ;;  %s1923_s3 = inlined_call_operand.vmem [shape: f32[1,256], index: 3, kind: input, shape index: {}]   ;;  %s1924_s4 = inlined_call_operand.hbm [shape: f32[8,2,64], index: 4, kind: output, shape index: {}]  }
   0x1   :  { %10 = vsyncpa [#allocation7], 0 }
   0x2   :  { %11 = vsyncpa [#allocation5], 0  ;;  %s1628_s15 = smov [#allocation6]   ;;  %s1534_s19 = scalar_lea.hbm %s1921_s1, 512 }
   0x3   :  { %s29_s16 = sshll.u32 %s1628_s15, 4  ;;  %p1535_p0 = scmp.ne.s32.totalorder %s1921_s1, %s1534_s19  ;;  %s30_s16 = int_to_ptr.vmem [resolvable:$true] %s29_s16 }
   0x4   :  { %p1538_p1 = scmp.lt.u32.totalorder %s1534_s19, %s1921_s1 }
   0x6   :  { %p1540_p2 = pnand %p1538_p1, %p1535_p0 }
   0x8   :  { %1543 = shalt.err (!%p1540_p2)
}
   0x9   :  { %s1544_s24 = scalar_lea.vmem %s30_s16, 512  ;;  %p1549_p4 = scmp.lt.s32.totalorder %s30_s16, %s30_s16 }
   0xa   :  { %p1545_p3 = scmp.ne.s32.totalorder %s30_s16, %s1544_s24  ;;  %p1550_p5 = scmp.lt.s32.totalorder %s1544_s24, %s1544_s24 }
   0xc   :  { %p1551_p6 = por %p1550_p5, %p1549_p4 }
   0xe   :  { %p1552_p7 = pnand %p1551_p6, %p1545_p3 }
  0x10   :  { %1555 = shalt.err (!%p1552_p7)
}
  0x11   :  { %s1629_s25 = smov 256   ;;  %s1630_s26 = smov 16  }
  0x12   :  { %35 = dma.hbm_to_vmem [thread:$0]  %s1921_s1, 512, %s30_s16, [#allocation7], %s1629_s25, %s1629_s25, %s1630_s26  }
  0x13   :  { %s1631_s29 = smov [#allocation3]   ;;  %s1556_s7 = scalar_lea.hbm %s1920_s0, 256 }
  0x14   :  { %s17_s30 = sshll.u32 %s1631_s29, 4  ;;  %p1557_p8 = scmp.ne.s32.totalorder %s1920_s0, %s1556_s7  ;;  %s18_s30 = int_to_ptr.vmem [resolvable:$true] %s17_s30 }
  0x15   :  { %p1560_p9 = scmp.lt.u32.totalorder %s1556_s7, %s1920_s0 }
  0x17   :  { %p1562_p10 = pnand %p1560_p9, %p1557_p8 }
  0x19   :  { %1565 = shalt.err (!%p1562_p10)
}
  0x1a   :  { %s1566_s12 = scalar_lea.vmem %s18_s30, 256  ;;  %p1571_p12 = scmp.lt.s32.totalorder %s18_s30, %s18_s30 }
  0x1b   :  { %p1567_p11 = scmp.ne.s32.totalorder %s18_s30, %s1566_s12  ;;  %p1572_p13 = scmp.lt.s32.totalorder %s1566_s12, %s1566_s12 }
  0x1d   :  { %p1573_p0 = por %p1572_p13, %p1571_p12 }
  0x1f   :  { %p1574_p1 = pnand %p1573_p0, %p1567_p11 }
  0x21   :  { %1577 = shalt.err (!%p1574_p1)
}
  0x22   :  { %s1632_s1 = smov 128   ;;  %s1633_s13 = smov 8  }
  0x23   :  { %23 = dma.hbm_to_vmem [thread:$0]  %s1920_s0, 256, %s18_s30, [#allocation4], %s1632_s1, %s1632_s1, %s1633_s13  }
  0x24   :  { %s1634_s16 = smov [#allocation8]   ;;  %s1578_s20 = scalar_lea.hbm %s1922_s2, 2048 }
  0x25   :  { %s41_s17 = sshll.u32 %s1634_s16, 4  ;;  %p1579_p2 = scmp.ne.s32.totalorder %s1922_s2, %s1578_s20  ;;  %s42_s17 = int_to_ptr.vmem [resolvable:$true] %s41_s17 }
  0x26   :  { %p1582_p3 = scmp.lt.u32.totalorder %s1578_s20, %s1922_s2 }
  0x28   :  { %p1584_p4 = pnand %p1582_p3, %p1579_p2 }
  0x2a   :  { %1587 = shalt.err (!%p1584_p4)
}
  0x2b   :  { %s1588_s27 = scalar_lea.vmem %s42_s17, 2048  ;;  %p1593_p6 = scmp.lt.s32.totalorder %s42_s17, %s42_s17 }
  0x2c   :  { %p1589_p5 = scmp.ne.s32.totalorder %s42_s17, %s1588_s27  ;;  %p1594_p7 = scmp.lt.s32.totalorder %s1588_s27, %s1588_s27 }
  0x2e   :  { %p1595_p8 = por %p1594_p7, %p1593_p6 }
  0x30   :  { %p1596_p9 = pnand %p1595_p8, %p1589_p5 }
  0x32   :  { %1599 = shalt.err (!%p1596_p9)
}
  0x33   :  { %47 = dma.hbm_to_vmem [thread:$0]  %s1922_s2, 2048, %s42_s17, [#allocation7], %s1629_s25, %s1629_s25, %s1630_s26  }
  0x34   :  { %1622 = dma.done.wait [#allocation4], 256  }
  0x35   :  { %1623 = vsyncadd [#allocation4], 4294967040 }
  0x36   :  { %1624 = dma.done.wait [#allocation7], 2560  }
  0x37   :  { %1625 = vsyncadd [#allocation7], 4294964736  ;;  %v1635_v0 = vmov 0.0   ;;  %v62_v1 = vld [vmem:[#allocation6 + $0x8] sm:$0xff]  ;;  %v64_v2 = vld [vmem:[#allocation6 + $0x18] sm:$0xff]  ;;  %vm77_vm0 = vcmask 130048   ;;  %v67_v33 = vlaneseq }
  0x38   :  { %148 = vmatprep.mubr.f32.mxu0 %v1635_v0  ;;  %278 = vmatprep.mubr.f32.mxu1 %v1635_v0  ;;  %v61_v3 = vld [vmem:[#allocation6] sm:$0xff]  ;;  %v1326_v4 = vpack.c.bf16 %v64_v2, %v62_v1  ;;  %v63_v5 = vld [vmem:[#allocation6 + $0x10] sm:$0xff]  ;;  %v195_v6 = vld [vmem:[#allocation8 + $0x8] sm:$0xff]  ;;  %vm321_vm3 = vcmask 254976   ;;  %vm324_vm4 = vcmask 517376   ;;  %vm210_vm5 = vcmask 523264  }
  0x39   :  { %v1328_v7 = vpack.c.bf16 %v63_v5, %v61_v3  ;;  %v197_v8 = vld [vmem:[#allocation8 + $0x18] sm:$0xff]  ;;  %v194_v9 = vld [vmem:[#allocation8] sm:$0xff]  ;;  %v196_v10 = vld [vmem:[#allocation8 + $0x10] sm:$0xff]  ;;  %v68_v34 = vshrl.u32 %v67_v33, 7  ;;  %v166_v47 = vand.u32 127, %v67_v33  ;;  %vm461_vm6 = vcmask 257026  }
  0x3a   :  { %1327 = vmatprep.subr.bf16.mxu0 %v1326_v4  ;;  %v59_v11 = vld [vmem:[#allocation3] sm:$0xff]  ;;  %v1709_v12 = vpack.c.bf16 %v197_v8, %v195_v6  ;;  %v1711_v13 = vpack.c.bf16 %v196_v10, %v194_v9  ;;  %v199_v14 = vld [vmem:[#allocation8 + $0x28] sm:$0xff]  ;;  %v201_v15 = vld [vmem:[#allocation8 + $0x38] sm:$0xff]  ;;  %vm464_vm7 = vcmask 519426   ;;  %vm747_vm8 = vcmask 261126   ;;  %s1637_s26 = smov [#allocation9]  }
  0x3b   :  { %1329 = vmatpush1.bf16.msra.mxu0 %v1328_v7  ;;  %v1713_v16 = vpack.c.bf16 %v201_v15, %v199_v14  ;;  %v198_v17 = vld [vmem:[#allocation8 + $0x20] sm:$0xff]  ;;  %v200_v18 = vld [vmem:[#allocation8 + $0x30] sm:$0xff]  ;;  %v203_v19 = vld [vmem:[#allocation8 + $0x48] sm:$0xff]  ;;  %v69_v35 = vsub.s32 0, %v68_v34  ;;  %v73_v37 = vsub.s32 1, %v68_v34  ;;  %v167_v49 = vadd.s32 128, %v166_v47 }
  0x3c   :  { %1331 = vmatprep.subr.bf16.mxu1 %v1709_v12  ;;  %v205_v20 = vld [vmem:[#allocation8 + $0x58] sm:$0xff]  ;;  %1347 = vmatprep.subr.bf16.mxu0 %v1709_v12  ;;  %v1718_v21 = vpack.c.bf16 %v200_v18, %v198_v17  ;;  %v202_v23 = vld [vmem:[#allocation8 + $0x40] sm:$0xff]  ;;  %v204_v24 = vld [vmem:[#allocation8 + $0x50] sm:$0xff]  ;;  %v172_v50 = vand.u32 63, %v166_v47  ;;  %vm750_vm9 = vcmask 523526   ;;  %vm604_vm10 = vcmask 259076  }
  0x3d   :  { %1333 = vmatpush1.bf16.msra.mxu1 %v1711_v13  ;;  %v1722_v22 = vpack.c.bf16 %v205_v20, %v203_v19  ;;  %v60_v25 = vld [vmem:[#allocation3 + $0x8] sm:$0xff]  ;;  %v207_v26 = vld [vmem:[#allocation8 + $0x68] sm:$0xff]  ;;  %v1728_v28 = vpack.c.bf16 %v204_v24, %v202_v23  ;;  %v206_v30 = vld [vmem:[#allocation8 + $0x60] sm:$0xff]  ;;  %v179_v51 = vand.u32 63, %v167_v49  ;;  %vm607_vm11 = vcmask 521476   ;;  %s1304_s29 = sshll.u32 %s1637_s26, 4  ;;  %s1305_s29 = int_to_ptr.vmem [resolvable:$true] %s1304_s29 }
  0x3e   :  { %1317 = vmatmul.mubr.msk.f32.vlgmr.msra.gmra.mrb[0].mxu0 %vm77_vm0, %v59_v11  ;;  %1335 = vmatprep.subr.bf16.mxu1 %v1713_v16  ;;  %v209_v27 = vld [vmem:[#allocation8 + $0x78] sm:$0xff]  ;;  %v208_v31 = vld [vmem:[#allocation8 + $0x70] sm:$0xff]  ;;  %vm1760_vm1 = vcmp.lt.s32.totalorder %v172_v50, 32  ;;  %s1600_s30 = scalar_lea.vmem %s1305_s29, 256  ;;  %p1605_p11 = scmp.lt.s32.totalorder %s1305_s29, %s1305_s29 }
  0x3f   :  { %154 = vmatprep.mubr.f32.mxu0 %v1635_v0  ;;  %1349 = vmatpush1.bf16.msra.mxu0 %v1711_v13  ;;  %v1732_v29 = vpack.c.bf16 %v209_v27, %v207_v26  ;;  %v1738_v32 = vpack.c.bf16 %v208_v31, %v206_v30  ;;  %v65_v36 = vld [vmem:[%s1923_s3] sm:$0x3]  ;;  %vm1766_vm2 = vcmp.lt.s32.totalorder %v179_v51, 32  ;;  %s1636_s3 = smov 64   ;;  %p1601_p10 = scmp.ne.s32.totalorder %s1305_s29, %s1600_s30 }
  0x40   :  { %1351 = vmatprep.subr.bf16.mxu0 %v1713_v16  ;;  %v70_v38 = vrot.slane %v65_v36, %v69_v35  ;;  %v74_v39 = vrot.slane %v65_v36, %v73_v37  ;;  %p1606_p12 = scmp.lt.s32.totalorder %s1600_s30, %s1600_s30 }
  0x41   :  { %1337 = vmatpush1.bf16.msra.mxu1 %v1718_v21 }
  0x42   :  { %1318 = vmatmul.mubr.msk.f32.gmra.mrb[2].mxu0 %vm77_vm0, %v60_v25  ;;  %1339 = vmatprep.subr.bf16.mxu1 %v1722_v22  ;;  %p1607_p13 = por %p1606_p12, %p1605_p11 }
  0x43   :  { %1353 = vmatpush1.bf16.msra.mxu0 %v1718_v21  ;;  %408 = vmatprep.mubr.f32.mxu0 %v1635_v0 }
  0x44   :  { %1355 = vmatprep.subr.bf16.mxu0 %v1722_v22  ;;  %p1608_p0 = pnand %p1607_p13, %p1601_p10 }
  0x45   :  { %1341 = vmatpush1.bf16.msra.mxu1 %v1728_v28 }
  0x46   :  { %1343 = vmatprep.subr.bf16.mxu1 %v1732_v29 }
  0x47   :  { %1357 = vmatpush1.bf16.msra.mxu0 %v1728_v28 }
  0x48   :  { %1359 = vmatprep.subr.bf16.mxu0 %v1732_v29 }
  0x49   :  { %1345 = vmatpush1.bf16.msra.mxu1 %v1738_v32 }
  0x4a   :  { %1363 = vmatprep.subr.bf16.mxu1 %v1709_v12 }
  0x4b   :  { %1361 = vmatpush1.bf16.msra.mxu0 %v1738_v32 }
  0x4c   :  { %279 = vmatmul.mubr.f32.vlgmr.msra.gmra.mrb[0].mxu1 %v1635_v0  ;;  %1379 = vmatprep.subr.bf16.mxu0 %v1709_v12 }
  0x4d   :  { %1365 = vmatpush1.bf16.msra.mxu1 %v1711_v13  ;;  %551 = vmatprep.mubr.f32.mxu1 %v1635_v0 }
  0x4e   :  { %1367 = vmatprep.subr.bf16.mxu1 %v1713_v16 }
  0x51   :  { %1369 = vmatpush1.bf16.msra.mxu1 %v1718_v21 }
  0x52   :  { %1371 = vmatprep.subr.bf16.mxu1 %v1722_v22 }
  0x55   :  { %1373 = vmatpush1.bf16.msra.mxu1 %v1728_v28 }
  0x56   :  { %1375 = vmatprep.subr.bf16.mxu1 %v1732_v29 }
  0x59   :  { %1377 = vmatpush1.bf16.msra.mxu1 %v1738_v32 }
  0x5a   :  { %1395 = vmatprep.subr.bf16.mxu1 %v1709_v12 }
 0x111   :  { %v150_v40 = vpop.f32.mrb[0].mxu0 }
 0x112   :  { %v151_v41 = vadd.f32 %v150_v40, %v70_v38  ;;  %v152_v42 = vpop.f32.mrb[1].mxu0 }
 0x113   :  { %v153_v43 = vadd.f32 %v152_v42, %v74_v39 }
 0x114   :  { %161 = vst [vmem:[#allocation2] sm:$0xff] %v151_v41 }
 0x115   :  { %162 = vst [vmem:[#allocation2 + $0x8] sm:$0xff] %v153_v43  ;;  %v156_v44 = vpop.f32.mrb[2].mxu0 }
 0x116   :  { %v157_v45 = vadd.f32 %v156_v44, %v70_v38  ;;  %v158_v46 = vpop.f32.mrb[3].mxu0 }
 0x117   :  { %v159_v48 = vadd.f32 %v158_v46, %v74_v39 }
 0x118   :  { %163 = vst [vmem:[#allocation2 + $0x10] sm:$0xff] %v157_v45 }
 0x119   :  { %164 = vst [vmem:[#allocation2 + $0x18] sm:$0xff] %v159_v48 }
 0x11b   :  { %v285_v58 = vld [vmem:[#allocation2] sm:$0x3]  ;;  %v415_v31 = vld [vmem:[#allocation2] sm:$0xc] }
 0x11c   :  { %v286_v63 = vld [vmem:[#allocation2 + $0x8] sm:$0x3]  ;;  %v416_v36 = vld [vmem:[#allocation2 + $0x8] sm:$0xc] }
 0x11f   :  { %v280_v52 = vpop.f32.mrb[0].mxu1  ;;  %v287_v53 = vld [vmem:[#allocation2 + $0x10] sm:$0xc0]  ;;  %v417_v24 = vld [vmem:[#allocation2 + $0x10] sm:$0x30] }
 0x120   :  { %v291_v54 = vrot.slane %v287_v53, 6  ;;  %v282_v55 = vpop.f32.mrb[1].mxu1  ;;  %v288_v56 = vld [vmem:[#allocation2 + $0x18] sm:$0xc0]  ;;  %v418_v25 = vld [vmem:[#allocation2 + $0x18] sm:$0x30] }
 0x121   :  { %v292_v59 = vrot.slane %v288_v56, 6  ;;  %v421_v26 = vrot.slane %v417_v24, 2  ;;  %v422_v27 = vrot.slane %v418_v25, 2 }
 0x122   :  { %v295_v60 = vsel %vm1760_vm1, %v285_v58, %v291_v54 }
 0x123   :  { %v297_v62 = vadd.f32 %v295_v60, %v280_v52  ;;  %v296_v1 = vsel %vm1766_vm2, %v286_v63, %v292_v59  ;;  %v425_v35 = vsel %vm1760_vm1, %v415_v31, %v421_v26  ;;  %v426_v39 = vsel %vm1766_vm2, %v416_v36, %v422_v27  ;;  %v560_v60 = vld [vmem:[#allocation2 + $0x10] sm:$0xc] }
 0x124   :  { %v298_v3 = vadd.f32 %v296_v1, %v282_v55  ;;  %v564_v63 = vrot.slane %v560_v60, 6 }
 0x125   :  { %v299_v2 = vmul.f32 0.5, %v297_v62  ;;  %v561_v62 = vld [vmem:[#allocation2 + $0x18] sm:$0xc] }
 0x126   :  { %v304_v9 = vmul.f32 0.5, %v298_v3  ;;  %v565_v1 = vrot.slane %v561_v62, 6 }
 0x127   :  { %1470 = vtanh.f32 %v299_v2 }
 0x128   :  { %1472 = vtanh.f32 %v298_v3  ;;  %v558_v3 = vld [vmem:[#allocation2] sm:$0x30] }
 0x129   :  { %1474 = vtanh.f32 %v304_v9 }
 0x131   :  { %v1471_v4 = vpop.eup %1470 }
 0x132   :  { %v301_v5 = vmul.f32 0.5, %v1471_v4  ;;  %v1473_v7 = vpop.eup %1472 }
 0x133   :  { %v1475_v15 = vpop.eup %1474 }
 0x134   :  { %v302_v6 = vadd.f32 0.5, %v301_v5  ;;  %v306_v17 = vmul.f32 0.5, %v1475_v15 }
 0x136   :  { %v309_v8 = vmul.f32 %v1473_v7, %v302_v6  ;;  %v308_v10 = vmul.f32 0.0, %v302_v6  ;;  %v307_v18 = vadd.f32 0.5, %v306_v17  ;;  %v568_v6 = vsel %vm1760_vm1, %v558_v3, %v564_v63  ;;  %v559_v7 = vld [vmem:[#allocation2 + $0x8] sm:$0x30] }
 0x138   :  { %311 = vrot.lane.b32.xlu0 %v309_v8, %s1636_s3 }
 0x1aa   :  { %v312_v11 = vpop.permute.xlu0 %311 }
 0x1ab   :  { %v314_v14 = vadd.f32 %v312_v11, %v308_v10  ;;  %v569_v10 = vsel %vm1766_vm2, %v559_v7, %v565_v1 }
 0x1ad   :  { %1476 = vtanh.f32 %v314_v14  ;;  %v445_v44 = vrot.slane %v314_v14, 6 }
 0x1b7   :  { %v1477_v19 = vpop.eup %1476 }
 0x1b8   :  { %v316_v20 = vmul.f32 %v1477_v19, %v307_v18 }
 0x1ba   :  { %318 = vrot.lane.b32.xlu0 %v316_v20, %s1636_s3 }
 0x22c   :  { %v319_v23 = vpop.permute.xlu0 %318 }
 0x22d   :  { %322 = vst.msk [vmem:[#allocation9] sm:$0x3] %vm321_vm3, %v319_v23  ;;  %1319 = vmatmul.mubr.msk.f32.vlgmr.msra.gmra.mrb[4].mxu0 %vm210_vm5, %v319_v23 }
 0x22e   :  { %325 = vst.msk [vmem:[#allocation9 + $0xe] sm:$0x3] %vm324_vm4, %v319_v23  ;;  %1381 = vmatpush1.bf16.msra.mxu0 %v1711_v13  ;;  %694 = vmatprep.mubr.f32.mxu0 %v1635_v0 }
 0x22f   :  { %1383 = vmatprep.subr.bf16.mxu0 %v1713_v16 }
 0x232   :  { %1385 = vmatpush1.bf16.msra.mxu0 %v1718_v21 }
 0x233   :  { %1387 = vmatprep.subr.bf16.mxu0 %v1722_v22 }
 0x236   :  { %1389 = vmatpush1.bf16.msra.mxu0 %v1728_v28 }
 0x237   :  { %1391 = vmatprep.subr.bf16.mxu0 %v1732_v29 }
 0x23a   :  { %1393 = vmatpush1.bf16.msra.mxu0 %v1738_v32 }
 0x23b   :  { %1411 = vmatprep.subr.bf16.mxu0 %v1709_v12 }
 0x300   :  { %v410_v30 = vpop.f32.mrb[4].mxu0 }
 0x301   :  { %v429_v33 = vrot.slane %v410_v30, 6  ;;  %v412_v34 = vpop.f32.mrb[5].mxu0 }
 0x302   :  { %v430_v37 = vrot.slane %v412_v34, 6 }
 0x303   :  { %v433_v38 = vadd.f32 %v429_v33, %v425_v35 }
 0x304   :  { %v434_v40 = vadd.f32 %v430_v37, %v426_v39  ;;  %v704_v39 = vld [vmem:[#allocation2 + $0x18] sm:$0x3] }
 0x305   :  { %v435_v41 = vmul.f32 0.5, %v433_v38  ;;  %v703_v38 = vld [vmem:[#allocation2 + $0x10] sm:$0x3] }
 0x306   :  { %v440_v49 = vmul.f32 0.5, %v434_v40 }
 0x307   :  { %1478 = vtanh.f32 %v435_v41  ;;  %v708_v41 = vrot.slane %v704_v39, 2 }
 0x308   :  { %1480 = vtanh.f32 %v434_v40  ;;  %v707_v40 = vrot.slane %v703_v38, 2 }
 0x309   :  { %1482 = vtanh.f32 %v440_v49 }
 0x311   :  { %v1479_v42 = vpop.eup %1478 }
 0x312   :  { %v437_v43 = vmul.f32 0.5, %v1479_v42  ;;  %v1481_v46 = vpop.eup %1480 }
 0x313   :  { %v1483_v52 = vpop.eup %1482 }
 0x314   :  { %v438_v45 = vadd.f32 0.5, %v437_v43  ;;  %v442_v53 = vmul.f32 0.5, %v1483_v52  ;;  %v701_v43 = vld [vmem:[#allocation2] sm:$0xc0] }
 0x316   :  { %v448_v47 = vmul.f32 %v1481_v46, %v438_v45  ;;  %v447_v48 = vmul.f32 %v445_v44, %v438_v45  ;;  %v443_v54 = vadd.f32 0.5, %v442_v53  ;;  %v711_v46 = vsel %vm1760_vm1, %v701_v43, %v707_v40 }
 0x318   :  { %450 = vrot.lane.b32.xlu1 %v448_v47, %s1636_s3  ;;  %v702_v47 = vld [vmem:[#allocation2 + $0x8] sm:$0xc0] }
 0x38a   :  { %v451_v50 = vpop.permute.xlu1 %450 }
 0x38b   :  { %v453_v51 = vadd.f32 %v451_v50, %v447_v48  ;;  %v712_v50 = vsel %vm1766_vm2, %v702_v47, %v708_v41  ;;  %v976_v47 = vld [vmem:[#allocation2] sm:$0x30] }
 0x38d   :  { %1484 = vtanh.f32 %v453_v51  ;;  %v588_v18 = vrot.slane %v453_v51, 6 }
 0x397   :  { %v1485_v55 = vpop.eup %1484 }
 0x398   :  { %v1791_v56 = vmul.f32 %v1485_v55, %v443_v54 }
 0x39a   :  { %v482_v58 = vrot.slane %v1791_v56, 2 }
 0x39c   :  { %483 = vrot.lane.b32.xlu1 %v482_v58, %s1636_s3 }
 0x40e   :  { %v484_v59 = vpop.permute.xlu1 %483 }
 0x40f   :  { %1320 = vmatmul.mubr.msk.f32.vlgmr.msra.gmra.mrb[2].mxu1 %vm210_vm5, %v484_v59 }
 0x410   :  { %1397 = vmatpush1.bf16.msra.mxu1 %v1711_v13  ;;  %837 = vmatprep.mubr.f32.mxu1 %v1635_v0 }
 0x411   :  { %1399 = vmatprep.subr.bf16.mxu1 %v1713_v16 }
 0x414   :  { %1401 = vmatpush1.bf16.msra.mxu1 %v1718_v21 }
 0x415   :  { %1403 = vmatprep.subr.bf16.mxu1 %v1722_v22 }
 0x418   :  { %1405 = vmatpush1.bf16.msra.mxu1 %v1728_v28 }
 0x419   :  { %1407 = vmatprep.subr.bf16.mxu1 %v1732_v29 }
 0x41c   :  { %1409 = vmatpush1.bf16.msra.mxu1 %v1738_v32 }
 0x41d   :  { %1427 = vmatprep.subr.bf16.mxu1 %v1709_v12 }
 0x4e2   :  { %v553_v2 = vpop.f32.mrb[2].mxu1 }
 0x4e3   :  { %v572_v4 = vrot.slane %v553_v2, 4  ;;  %v555_v5 = vpop.f32.mrb[3].mxu1 }
 0x4e4   :  { %v573_v8 = vrot.slane %v555_v5, 4 }
 0x4e5   :  { %v576_v9 = vadd.f32 %v572_v4, %v568_v6 }
 0x4e6   :  { %v577_v11 = vadd.f32 %v573_v8, %v569_v10  ;;  %v847_v10 = vld [vmem:[#allocation2 + $0x8] sm:$0xc0] }
 0x4e7   :  { %v578_v14 = vmul.f32 0.5, %v576_v9  ;;  %v846_v9 = vld [vmem:[#allocation2] sm:$0xc0] }
 0x4e8   :  { %v583_v25 = vmul.f32 0.5, %v577_v11 }
 0x4e9   :  { %1486 = vtanh.f32 %v578_v14  ;;  %v850_v14 = vrot.slane %v846_v9, 6 }
 0x4ea   :  { %1488 = vtanh.f32 %v577_v11  ;;  %v844_v11 = vld [vmem:[#allocation2 + $0x10] sm:$0x3] }
 0x4eb   :  { %1490 = vtanh.f32 %v583_v25 }
 0x4f3   :  { %v1487_v15 = vpop.eup %1486 }
 0x4f4   :  { %v580_v17 = vmul.f32 0.5, %v1487_v15  ;;  %v1489_v20 = vpop.eup %1488  ;;  %v845_v15 = vld [vmem:[#allocation2 + $0x18] sm:$0x3] }
 0x4f5   :  { %v1491_v30 = vpop.eup %1490 }
 0x4f6   :  { %v581_v19 = vadd.f32 0.5, %v580_v17  ;;  %v585_v31 = vmul.f32 0.5, %v1491_v30  ;;  %v851_v17 = vrot.slane %v847_v10, 6 }
 0x4f8   :  { %v591_v23 = vmul.f32 %v1489_v20, %v581_v19  ;;  %v590_v24 = vmul.f32 %v588_v18, %v581_v19  ;;  %v586_v33 = vadd.f32 0.5, %v585_v31  ;;  %v854_v19 = vsel %vm1760_vm1, %v844_v11, %v850_v14  ;;  %v1115_v11 = vld [vmem:[#allocation2] sm:$0xc]  ;;  %v1116_v14 = vld [vmem:[#allocation2 + $0x8] sm:$0xc] }
 0x4fa   :  { %593 = vrot.lane.b32.xlu0 %v591_v23, %s1636_s3 }
 0x56c   :  { %v594_v26 = vpop.permute.xlu0 %593 }
 0x56d   :  { %v596_v27 = vadd.f32 %v594_v26, %v590_v24  ;;  %v855_v24 = vsel %vm1766_vm2, %v845_v15, %v851_v17  ;;  %v1113_v15 = vld [vmem:[#allocation2 + $0x10] sm:$0x30] }
 0x56f   :  { %1492 = vtanh.f32 %v596_v27  ;;  %v731_v54 = vrot.slane %v596_v27, 6 }
 0x579   :  { %v1493_v34 = vpop.eup %1492 }
 0x57a   :  { %v1810_v35 = vmul.f32 %v1493_v34, %v586_v33 }
 0x57c   :  { %v625_v36 = vrot.slane %v1810_v35, 4 }
 0x57e   :  { %626 = vrot.lane.b32.xlu1 %v625_v36, %s1636_s3 }
 0x5f0   :  { %v627_v37 = vpop.permute.xlu1 %626 }
 0x5f1   :  { %1321 = vmatmul.mubr.msk.f32.vlgmr.msra.gmra.mrb[6].mxu0 %vm210_vm5, %v627_v37 }
 0x5f2   :  { %1413 = vmatpush1.bf16.msra.mxu0 %v1711_v13  ;;  %967 = vmatprep.mubr.f32.mxu0 %v1635_v0 }
 0x5f3   :  { %1415 = vmatprep.subr.bf16.mxu0 %v1713_v16 }
 0x5f6   :  { %1417 = vmatpush1.bf16.msra.mxu0 %v1718_v21 }
 0x5f7   :  { %1419 = vmatprep.subr.bf16.mxu0 %v1722_v22 }
 0x5fa   :  { %1421 = vmatpush1.bf16.msra.mxu0 %v1728_v28 }
 0x5fb   :  { %1423 = vmatprep.subr.bf16.mxu0 %v1732_v29 }
 0x5fe   :  { %1425 = vmatpush1.bf16.msra.mxu0 %v1738_v32 }
 0x5ff   :  { %1443 = vmatprep.subr.bf16.mxu0 %v1709_v12 }
 0x6c4   :  { %v696_v42 = vpop.f32.mrb[6].mxu0 }
 0x6c5   :  { %v715_v44 = vrot.slane %v696_v42, 2  ;;  %v698_v45 = vpop.f32.mrb[7].mxu0 }
 0x6c6   :  { %v716_v48 = vrot.slane %v698_v45, 2 }
 0x6c7   :  { %v719_v49 = vadd.f32 %v715_v44, %v711_v46 }
 0x6c8   :  { %v720_v51 = vadd.f32 %v716_v48, %v712_v50  ;;  %v977_v48 = vld [vmem:[#allocation2 + $0x8] sm:$0x30] }
 0x6c9   :  { %v721_v52 = vmul.f32 0.5, %v719_v49  ;;  %v974_v49 = vld [vmem:[#allocation2 + $0x10] sm:$0xc] }
 0x6ca   :  { %v726_v62 = vmul.f32 0.5, %v720_v51 }
 0x6cb   :  { %1494 = vtanh.f32 %v721_v52 }
 0x6cc   :  { %1496 = vtanh.f32 %v720_v51  ;;  %v980_v51 = vrot.slane %v976_v47, 2 }
 0x6cd   :  { %1498 = vtanh.f32 %v726_v62 }
 0x6d5   :  { %v1495_v12 = vpop.eup %1494 }
 0x6d6   :  { %v723_v53 = vmul.f32 0.5, %v1495_v12  ;;  %v1497_v58 = vpop.eup %1496  ;;  %v981_v12 = vrot.slane %v977_v48, 2 }
 0x6d7   :  { %v1499_v2 = vpop.eup %1498 }
 0x6d8   :  { %v724_v55 = vadd.f32 0.5, %v723_v53  ;;  %v728_v3 = vmul.f32 0.5, %v1499_v2 }
 0x6da   :  { %v734_v59 = vmul.f32 %v1497_v58, %v724_v55  ;;  %v733_v60 = vmul.f32 %v731_v54, %v724_v55  ;;  %v729_v4 = vadd.f32 0.5, %v728_v3 }
 0x6dc   :  { %736 = vrot.lane.b32.xlu0 %v734_v59, %s1636_s3 }
 0x74e   :  { %v737_v63 = vpop.permute.xlu0 %736 }
 0x74f   :  { %v739_v1 = vadd.f32 %v737_v63, %v733_v60 }
 0x751   :  { %1500 = vtanh.f32 %v739_v1  ;;  %v868_v31 = vrot.slane %v739_v1, 6 }
 0x75b   :  { %v1501_v5 = vpop.eup %1500 }
 0x75c   :  { %v1829_v6 = vmul.f32 %v1501_v5, %v729_v4 }
 0x75e   :  { %v768_v7 = vrot.slane %v1829_v6, 6 }
 0x760   :  { %769 = vrot.lane.b32.xlu1 %v768_v7, %s1636_s3 }
 0x7d2   :  { %v770_v8 = vpop.permute.xlu1 %769 }
 0x7d3   :  { %1322 = vmatmul.mubr.msk.f32.vlgmr.msra.gmra.mrb[4].mxu1 %vm210_vm5, %v770_v8 }
 0x7d4   :  { %1429 = vmatpush1.bf16.msra.mxu1 %v1711_v13  ;;  %1106 = vmatprep.mubr.f32.mxu1 %v1635_v0 }
 0x7d5   :  { %1431 = vmatprep.subr.bf16.mxu1 %v1713_v16 }
 0x7d8   :  { %1433 = vmatpush1.bf16.msra.mxu1 %v1718_v21 }
 0x7d9   :  { %1435 = vmatprep.subr.bf16.mxu1 %v1722_v22 }
 0x7dc   :  { %1437 = vmatpush1.bf16.msra.mxu1 %v1728_v28 }
 0x7dd   :  { %1439 = vmatprep.subr.bf16.mxu1 %v1732_v29 }
 0x7e0   :  { %1441 = vmatpush1.bf16.msra.mxu1 %v1738_v32 }
 0x8a6   :  { %v839_v18 = vpop.f32.mrb[4].mxu1 }
 0x8a7   :  { %v856_v20 = vadd.f32 %v854_v19, %v839_v18  ;;  %v841_v23 = vpop.f32.mrb[5].mxu1  ;;  %v1119_v18 = vrot.slane %v1115_v11, 6  ;;  %v1114_v19 = vld [vmem:[#allocation2 + $0x18] sm:$0x30] }
 0x8a8   :  { %v857_v25 = vadd.f32 %v855_v24, %v841_v23  ;;  %v1120_v24 = vrot.slane %v1116_v14, 6 }
 0x8a9   :  { %v858_v26 = vmul.f32 0.5, %v856_v20 }
 0x8aa   :  { %v863_v38 = vmul.f32 0.5, %v857_v25 }
 0x8ab   :  { %1502 = vtanh.f32 %v858_v26 }
 0x8ac   :  { %1504 = vtanh.f32 %v857_v25  ;;  %v1123_v25 = vsel %vm1760_vm1, %v1113_v15, %v1119_v18 }
 0x8ad   :  { %1506 = vtanh.f32 %v863_v38 }
 0x8b5   :  { %v1503_v27 = vpop.eup %1502 }
 0x8b6   :  { %v860_v30 = vmul.f32 0.5, %v1503_v27  ;;  %v1505_v34 = vpop.eup %1504 }
 0x8b7   :  { %v1507_v41 = vpop.eup %1506 }
 0x8b8   :  { %v861_v33 = vadd.f32 0.5, %v860_v30  ;;  %v865_v42 = vmul.f32 0.5, %v1507_v41  ;;  %v1124_v30 = vsel %vm1766_vm2, %v1114_v19, %v1120_v24 }
 0x8ba   :  { %v871_v36 = vmul.f32 %v1505_v34, %v861_v33  ;;  %v870_v37 = vmul.f32 %v868_v31, %v861_v33  ;;  %v866_v43 = vadd.f32 0.5, %v865_v42 }
 0x8bc   :  { %873 = vrot.lane.b32.xlu0 %v871_v36, %s1636_s3 }
 0x92e   :  { %v874_v39 = vpop.permute.xlu0 %873 }
 0x92f   :  { %v876_v40 = vadd.f32 %v874_v39, %v870_v37 }
 0x931   :  { %1508 = vtanh.f32 %v876_v40  ;;  %v1004_v55 = vrot.slane %v876_v40, 6 }
 0x93b   :  { %v1509_v44 = vpop.eup %1508 }
 0x93c   :  { %v878_v45 = vmul.f32 %v1509_v44, %v866_v43 }
 0x93e   :  { %880 = vrot.lane.b32.xlu1 %v878_v45, %s1636_s3 }
 0x9b0   :  { %v1848_v46 = vpop.permute.xlu1 %880 }
 0x9b1   :  { %1323 = vmatmul.mubr.msk.f32.vlgmr.msra.gmra.mrb[8].mxu0 %vm210_vm5, %v1848_v46 }
 0x9b2   :  { %1445 = vmatpush1.bf16.msra.mxu0 %v1711_v13  ;;  %1245 = vmatprep.mubr.f32.mxu0 %v1635_v0  ;;  %v975_v13 = vld [vmem:[#allocation2 + $0x18] sm:$0xc] }
 0x9b3   :  { %1447 = vmatprep.subr.bf16.mxu0 %v1713_v16  ;;  %v984_v16 = vsel %vm1760_vm1, %v974_v49, %v980_v51 }
 0x9b6   :  { %1449 = vmatpush1.bf16.msra.mxu0 %v1718_v21 }
 0x9b7   :  { %1451 = vmatprep.subr.bf16.mxu0 %v1722_v22 }
 0x9ba   :  { %1453 = vmatpush1.bf16.msra.mxu0 %v1728_v28  ;;  %v985_v28 = vsel %vm1766_vm2, %v975_v13, %v981_v12  ;;  %v1255_v12 = vld [vmem:[#allocation2 + $0x8] sm:$0x3] }
 0x9bb   :  { %1455 = vmatprep.subr.bf16.mxu0 %v1732_v29 }
 0x9be   :  { %1457 = vmatpush1.bf16.msra.mxu0 %v1738_v32 }
 0xa84   :  { %v969_v50 = vpop.f32.mrb[8].mxu0 }
 0xa85   :  { %v988_v52 = vrot.slane %v969_v50, 6  ;;  %v971_v0 = vpop.f32.mrb[9].mxu0 }
 0xa86   :  { %v989_v21 = vrot.slane %v971_v0, 6 }
 0xa87   :  { %v992_v22 = vadd.f32 %v988_v52, %v984_v16  ;;  %v1252_v16 = vld [vmem:[#allocation2 + $0x10] sm:$0xc0] }
 0xa88   :  { %v993_v29 = vadd.f32 %v989_v21, %v985_v28  ;;  %v1253_v28 = vld [vmem:[#allocation2 + $0x18] sm:$0xc0] }
 0xa89   :  { %v994_v53 = vmul.f32 0.5, %v992_v22 }
 0xa8a   :  { %v999_v63 = vmul.f32 0.5, %v993_v29 }
 0xa8b   :  { %1510 = vtanh.f32 %v994_v53 }
 0xa8c   :  { %1512 = vtanh.f32 %v993_v29 }
 0xa8d   :  { %1514 = vtanh.f32 %v999_v63 }
 0xa95   :  { %v1511_v32 = vpop.eup %1510 }
 0xa96   :  { %v996_v54 = vmul.f32 0.5, %v1511_v32  ;;  %v1513_v59 = vpop.eup %1512  ;;  %v1259_v32 = vrot.slane %v1255_v12, 2 }
 0xa97   :  { %v1515_v3 = vpop.eup %1514 }
 0xa98   :  { %v997_v58 = vadd.f32 0.5, %v996_v54  ;;  %v1001_v4 = vmul.f32 0.5, %v1515_v3 }
 0xa9a   :  { %v1007_v60 = vmul.f32 %v1513_v59, %v997_v58  ;;  %v1006_v62 = vmul.f32 %v1004_v55, %v997_v58  ;;  %v1002_v5 = vadd.f32 0.5, %v1001_v4  ;;  %v1263_v58 = vsel %vm1766_vm2, %v1253_v28, %v1259_v32 }
 0xa9c   :  { %1009 = vrot.lane.b32.xlu0 %v1007_v60, %s1636_s3 }
 0xb0e   :  { %v1010_v1 = vpop.permute.xlu0 %1009 }
 0xb0f   :  { %v1012_v2 = vadd.f32 %v1010_v1, %v1006_v62 }
 0xb11   :  { %1516 = vtanh.f32 %v1012_v2  ;;  %v1143_v37 = vrot.slane %v1012_v2, 6 }
 0xb1b   :  { %v1517_v7 = vpop.eup %1516 }
 0xb1c   :  { %v1865_v8 = vmul.f32 %v1517_v7, %v1002_v5 }
 0xb1e   :  { %v1037_v9 = vrot.slane %v1865_v8, 2 }
 0xb20   :  { %1038 = vrot.lane.b32.xlu1 %v1037_v9, %s1636_s3 }
 0xb92   :  { %v1039_v10 = vpop.permute.xlu1 %1038 }
 0xb93   :  { %1324 = vmatmul.mubr.msk.f32.vlgmr.msra.gmra.mrb[6].mxu1 %vm210_vm5, %v1039_v10 }
 0xc66   :  { %v1108_v17 = vpop.f32.mrb[6].mxu1 }
 0xc67   :  { %v1127_v20 = vrot.slane %v1108_v17, 4  ;;  %v1110_v23 = vpop.f32.mrb[7].mxu1 }
 0xc68   :  { %v1128_v26 = vrot.slane %v1110_v23, 4 }
 0xc69   :  { %v1131_v27 = vadd.f32 %v1127_v20, %v1123_v25 }
 0xc6a   :  { %v1132_v31 = vadd.f32 %v1128_v26, %v1124_v30 }
 0xc6b   :  { %v1133_v33 = vmul.f32 0.5, %v1131_v27 }
 0xc6c   :  { %v1138_v42 = vmul.f32 0.5, %v1132_v31 }
 0xc6d   :  { %1518 = vtanh.f32 %v1133_v33 }
 0xc6e   :  { %1520 = vtanh.f32 %v1132_v31 }
 0xc6f   :  { %1522 = vtanh.f32 %v1138_v42 }
 0xc77   :  { %v1519_v34 = vpop.eup %1518 }
 0xc78   :  { %v1135_v36 = vmul.f32 0.5, %v1519_v34  ;;  %v1521_v39 = vpop.eup %1520 }
 0xc79   :  { %v1523_v45 = vpop.eup %1522 }
 0xc7a   :  { %v1136_v38 = vadd.f32 0.5, %v1135_v36  ;;  %v1140_v47 = vmul.f32 0.5, %v1523_v45 }
 0xc7c   :  { %v1146_v40 = vmul.f32 %v1521_v39, %v1136_v38  ;;  %v1145_v41 = vmul.f32 %v1143_v37, %v1136_v38  ;;  %v1141_v48 = vadd.f32 0.5, %v1140_v47 }
 0xc7e   :  { %1148 = vrot.lane.b32.xlu0 %v1146_v40, %s1636_s3 }
 0xcf0   :  { %v1149_v43 = vpop.permute.xlu0 %1148 }
 0xcf1   :  { %v1151_v44 = vadd.f32 %v1149_v43, %v1145_v41 }
 0xcf3   :  { %1524 = vtanh.f32 %v1151_v44  ;;  %v1282_v1 = vrot.slane %v1151_v44, 6 }
 0xcfd   :  { %v1525_v49 = vpop.eup %1524 }
 0xcfe   :  { %v1153_v50 = vmul.f32 %v1525_v49, %v1141_v48 }
 0xd00   :  { %v1176_v51 = vrot.slane %v1153_v50, 4 }
 0xd02   :  { %1177 = vrot.lane.b32.xlu1 %v1176_v51, %s1636_s3 }
 0xd06   :  { %457 = vrot.lane.b32.xlu1 %v1791_v56, %s1636_s3 }
 0xd0a   :  { %743 = vrot.lane.b32.xlu1 %v1829_v6, %s1636_s3  ;;  %v1254_v6 = vld [vmem:[#allocation2] sm:$0x3] }
 0xd0b   :  { %v1258_v22 = vrot.slane %v1254_v6, 2 }
 0xd0d   :  { %v1262_v54 = vsel %vm1760_vm1, %v1252_v16, %v1258_v22 }
 0xd0e   :  { %1155 = vrot.lane.b32.xlu1 %v1153_v50, %s1636_s3 }
 0xd74   :  { %v1178_v13 = vpop.permute.xlu1 %1177 }
 0xd75   :  { %1325 = vmatmul.mubr.msk.f32.vlgmr.msra.gmra.mrb[10].mxu0 %vm210_vm5, %v1178_v13 }
 0xd78   :  { %v458_v52 = vpop.permute.xlu1 %457 }
 0xd79   :  { %462 = vst.msk [vmem:[#allocation9] sm:$0xc] %vm461_vm6, %v458_v52 }
 0xd7a   :  { %465 = vst.msk [vmem:[#allocation9 + $0xa] sm:$0xc] %vm464_vm7, %v458_v52 }
 0xd7c   :  { %v744_v0 = vpop.permute.xlu1 %743 }
 0xd7d   :  { %748 = vst.msk [vmem:[#allocation9] sm:$0xc0] %vm747_vm8, %v744_v0 }
 0xd7e   :  { %751 = vst.msk [vmem:[#allocation9 + $0x2] sm:$0xc0] %vm750_vm9, %v744_v0 }
 0xd7f   :  { %883 = vst.msk [vmem:[#allocation9 + $0x8] sm:$0x3] %vm321_vm3, %v1848_v46 }
 0xd80   :  { %884 = vst.msk [vmem:[#allocation9 + $0x6] sm:$0x3] %vm324_vm4, %v1848_v46  ;;  %v1156_v56 = vpop.permute.xlu1 %1155 }
 0xd81   :  { %1158 = vst.msk [vmem:[#allocation9 + $0x8] sm:$0x30] %vm604_vm10, %v1156_v56 }
 0xd82   :  { %1159 = vst.msk [vmem:[#allocation9 - $0x2] sm:$0x30] %vm607_vm11, %v1156_v56 }
 0xe48   :  { %v1247_v21 = vpop.f32.mrb[10].mxu0 }
 0xe49   :  { %v1266_v29 = vrot.slane %v1247_v21, 2  ;;  %v1249_v53 = vpop.f32.mrb[11].mxu0 }
 0xe4a   :  { %v1267_v46 = vrot.slane %v1249_v53, 2 }
 0xe4b   :  { %v1270_v55 = vadd.f32 %v1266_v29, %v1262_v54 }
 0xe4c   :  { %v1271_v59 = vadd.f32 %v1267_v46, %v1263_v58 }
 0xe4d   :  { %v1272_v60 = vmul.f32 0.5, %v1270_v55 }
 0xe4e   :  { %v1277_v57 = vmul.f32 0.5, %v1271_v59 }
 0xe4f   :  { %1526 = vtanh.f32 %v1272_v60 }
 0xe50   :  { %1528 = vtanh.f32 %v1271_v59 }
 0xe51   :  { %1530 = vtanh.f32 %v1277_v57 }
 0xe59   :  { %v1527_v62 = vpop.eup %1526 }
 0xe5a   :  { %v1274_v63 = vmul.f32 0.5, %v1527_v62  ;;  %v1529_v3 = vpop.eup %1528 }
 0xe5b   :  { %v1531_v10 = vpop.eup %1530 }
 0xe5c   :  { %v1275_v2 = vadd.f32 0.5, %v1274_v63  ;;  %v1279_v14 = vmul.f32 0.5, %v1531_v10 }
 0xe5e   :  { %v1285_v4 = vmul.f32 %v1529_v3, %v1275_v2  ;;  %v1284_v5 = vmul.f32 %v1282_v1, %v1275_v2 }
 0xe60   :  { %1287 = vrot.lane.b32.xlu0 %v1285_v4, %s1636_s3 }
 0xe64   :  { %600 = vrot.lane.b32.xlu0 %v1810_v35, %s1636_s3  ;;  %v1280_v35 = vadd.f32 0.5, %v1279_v14 }
 0xe68   :  { %1016 = vrot.lane.b32.xlu0 %v1865_v8, %s1636_s3 }
 0xed2   :  { %v1288_v61 = vpop.permute.xlu0 %1287 }
 0xed3   :  { %v1290_v7 = vadd.f32 %v1288_v61, %v1284_v5 }
 0xed5   :  { %1532 = vtanh.f32 %v1290_v7 }
 0xed6   :  { %v601_v9 = vpop.permute.xlu0 %600 }
 0xed7   :  { %605 = vst.msk [vmem:[#allocation9] sm:$0x30] %vm604_vm10, %v601_v9 }
 0xed8   :  { %608 = vst.msk [vmem:[#allocation9 + $0x6] sm:$0x30] %vm607_vm11, %v601_v9 }
 0xeda   :  { %v1017_v11 = vpop.permute.xlu0 %1016 }
 0xedb   :  { %1019 = vst.msk [vmem:[#allocation9 + $0x8] sm:$0xc] %vm461_vm6, %v1017_v11 }
 0xedc   :  { %1020 = vst.msk [vmem:[#allocation9 + $0x2] sm:$0xc] %vm464_vm7, %v1017_v11 }
 0xedf   :  { %v1533_v15 = vpop.eup %1532 }
 0xee0   :  { %v1292_v8 = vmul.f32 %v1533_v15, %v1280_v35 }
 0xee2   :  { %1294 = vrot.lane.b32.xlu0 %v1292_v8, %s1636_s3 }
 0xf54   :  { %v1295_v17 = vpop.permute.xlu0 %1294 }
 0xf55   :  { %1297 = vst.msk [vmem:[#allocation9 + $0x8] sm:$0xc0] %vm747_vm8, %v1295_v17 }
 0xf56   :  { %1298 = vst.msk [vmem:[#allocation9 - $0x6] sm:$0xc0] %vm750_vm9, %v1295_v17 }
 0xf57   :  { %1611 = shalt.err (!%p1608_p0)
}
 0xf58   :  { %s1612_s7 = scalar_lea.hbm %s1924_s4, 256 }
 0xf59   :  { %p1613_p1 = scmp.ne.s32.totalorder %s1924_s4, %s1612_s7  ;;  %p1616_p2 = scmp.lt.u32.totalorder %s1612_s7, %s1924_s4 }
 0xf5b   :  { %p1618_p3 = pnand %p1616_p2, %p1613_p1 }
 0xf5d   :  { %1621 = shalt.err (!%p1618_p3)
}
 0xf5e   :  { %s1638_s12 = smov 32   ;;  %s1639_s1 = smov 2  }
 0xf5f   :  { %1310 = dma.vmem_to_hbm [thread:$0]  %s1305_s29, 256, %s1924_s4, [#allocation5], %s1638_s12, %s1638_s12, %s1639_s1  }
 0xf60   :  { %1626 = dma.done.wait [#allocation5], 256  }
 0xf61   :  { %1627 = vsyncadd [#allocation5], 4294967040 }
 0xf62   :  { %1314 = vsyncpa [#allocation4], 1 }
 0xf63   :  { %1315 = vsyncpa [#allocation7], 1 }
 0xf64   :  { %1316 = vsyncpa [#allocation5], 1 }

</bundles_post_ra>
